<compile_context>
chip_gen: v6e
topology: v6e:2x2x1
jax: 0.10.0
libtpu: 0.0.40
codegen_flags: <defaults>
</compile_context>

<pallas_src>
import jax
import jax.numpy as jnp
from jax.experimental import pallas as pl
from jax.experimental.pallas import tpu as pltpu

_GN_EPS = 1e-5
_MXU_DTYPE = jnp.float32      # see TODO above: bf16 option for v6e/v7x at large C


# ---------------------------------------------------------------------------
# Fused whole-block kernel (all three conv->GN->PReLU stages + residual)
# ---------------------------------------------------------------------------

def _make_brb_kernel(C, H, W):
    Wp = W + 2                 # padded row width
    L = H * Wp                 # extended flat spatial length (2 junk cols/row)
    Lp = (H + 2) * Wp + 2      # padded-flat buffer length (+2 tap-overrun margin)
    inv_cnt = 1.0 / float(C * H * W)

    def kernel(x_ref, w_ref, p_ref, o_ref, xp0, xp1, xp2):
        # ---- zero the pad halos in VMEM (replaces wrapper-side jnp.pad) ----
        xp0[...] = jnp.zeros_like(xp0)
        xp1[...] = jnp.zeros_like(xp1)
        xp2[...] = jnp.zeros_like(xp2)

        # ---- fill xp0 with this sample: x[py, px] -> flat (py+1)*Wp+(px+1) --
        xv = x_ref[0]                                    # (C, H, W)
        for py in range(H):
            base = (py + 1) * Wp + 1
            xp0[:, base:base + W] = xv[:, py, :]

        # Valid-column mask over the extended flat layout (px < W).
        col = jax.lax.broadcasted_iota(jnp.int32, (C, L), 1)
        valid = (col % Wp) < W

        gamma = p_ref[:, 0:1]                            # (C, 1)
        beta = p_ref[:, 1:2]
        alpha = p_ref[:, 2:3]

        def conv_gn_prelu(xp, stage, res):
            # 3x3 conv as 9 shifted-slice matmuls accumulated in f32.  Each
            # tap (dy, dx) is the contiguous lane-slice [dy*Wp+dx : +L] of the
            # padded-flat buffer -> no im2col concat, no reshape relayout, and
            # the (Cout, L) result keeps H*W on lanes (lane-dense epilogue).
            acc = jnp.zeros((C, L), jnp.float32)
            for dy in range(3):
                for dx in range(3):
                    off = dy * Wp + dx
                    x_tap = xp[:, off:off + L].astype(_MXU_DTYPE)        # (Cin, L)
                    w_tap = w_ref[stage, 3 * dy + dx, :, :].astype(_MXU_DTYPE)
                    acc = acc + jnp.dot(w_tap, x_tap,
                                        preferred_element_type=jnp.float32)
            y = jnp.where(valid, acc, 0.0)               # zero junk -> exact stats
            # GroupNorm(num_groups=1): one-pass stats + fused scale/shift.
            s1 = jnp.sum(y, keepdims=True)               # (1, 1)
            s2 = jnp.sum(y * y, keepdims=True)
            mean = s1 * inv_cnt
            var = s2 * inv_cnt - mean * mean
            scale = gamma * jax.lax.rsqrt(var + _GN_EPS)  # (C, 1)
            shift = beta - mean * scale
            y = y * scale + shift
            if res is not None:
                y = y + res                               # residual pre-activation
            return jnp.where(y >= 0.0, y, alpha * y)      # per-channel PReLU

        # Stage 1: act(norm(conv_1(x)))
        a1 = conv_gn_prelu(xp0, 0, None)
        xp1[:, Wp + 1:Wp + 1 + L] = jnp.where(valid, a1, 0.0)   # re-pad in VMEM
        # Stage 2: act(norm(conv_2(x1)))
        a2 = conv_gn_prelu(xp1, 1, None)
        xp2[:, Wp + 1:Wp + 1 + L] = jnp.where(valid, a2, 0.0)
        # Stage 3: act(norm(conv_out(x2)) + x); residual = resident input tile.
        res = xp0[:, Wp + 1:Wp + 1 + L]
        a3 = conv_gn_prelu(xp2, 2, res)

        o_ref[0] = a3                                     # lane-dense (C, L) store

    return kernel, L, Lp


# ---------------------------------------------------------------------------
# Wrapper: NCHW in / NCHW out, matching the PyTorch module
# ---------------------------------------------------------------------------

def brb_forward(params, x):
    """BRB forward. x: (N, C, H, W) float32 -> (N, C, H, W)."""
    x = x.astype(jnp.float32)
    N, C, H, W = x.shape
    Wp = W + 2

    kernel, L, Lp = _make_brb_kernel(C, H, W)

    # Conv weights OIHW (PyTorch) -> (stage, tap, Cout, Cin), tap = 3*ky + kx.
    def prep(w):
        return jnp.transpose(w.astype(jnp.float32), (2, 3, 0, 1)).reshape(9, C, C)

    w_all = jnp.stack([prep(params["w1"]), prep(params["w2"]), prep(params["wout"])])
    # gamma / beta / alpha packed into a single tiny operand (C, 3).
    gba = jnp.stack([params["gamma"], params["beta"], params["alpha"]],
                    axis=1).astype(jnp.float32)

    out_ext = pl.pallas_call(
        kernel,
        out_shape=jax.ShapeDtypeStruct((N, C, L), jnp.float32),
        grid=(N,),   # one sample/step; N=2 shards across both v7x TensorCores
        in_specs=[
            pl.BlockSpec((1, C, H, W), lambda n: (n, 0, 0, 0)),
            pl.BlockSpec((3, 9, C, C), lambda n: (0, 0, 0, 0)),
            pl.BlockSpec((C, 3), lambda n: (0, 0)),
        ],
        out_specs=pl.BlockSpec((1, C, L), lambda n: (n, 0, 0)),
        scratch_shapes=[pltpu.VMEM((C, Lp), jnp.float32)] * 3,
        compiler_params=pltpu.CompilerParams(
            dimension_semantics=("parallel",),
            vmem_limit_bytes=32 * 1024 * 1024,
        ),
    )(x, w_all, gba)

    # Drop the two junk columns per row (free metadata reshape + cheap slice).
    return out_ext.reshape(N, C, H, Wp)[:, :, :, :W]


# ---------------------------------------------------------------------------
# Pure-JAX reference (correctness check only)
# ---------------------------------------------------------------------------

def brb_reference(params, x):
    x = x.astype(jnp.float32)
    g = params["gamma"].reshape(1, -1, 1, 1)
    b = params["beta"].reshape(1, -1, 1, 1)
    a = params["alpha"].reshape(1, -1, 1, 1)

    def conv(v, w):
        return jax.lax.conv_general_dilated(
            v, w.astype(jnp.float32), window_strides=(1, 1), padding="SAME",
            dimension_numbers=("NCHW", "OIHW", "NCHW"),
            precision=jax.lax.Precision.HIGHEST)

    def gn(v):
        mean = jnp.mean(v, axis=(1, 2, 3), keepdims=True)
        var = jnp.mean(jnp.square(v - mean), axis=(1, 2, 3), keepdims=True)
        return (v - mean) * jax.lax.rsqrt(var + _GN_EPS) * g + b

    def prelu(v):
        return jnp.where(v >= 0.0, v, a * v)

    x1 = prelu(gn(conv(x, params["w1"])))
    x2 = prelu(gn(conv(x1, params["w2"])))
    return prelu(gn(conv(x2, params["wout"])) + x)


# ---------------------------------------------------------------------------

if __name__ == "__main__":
    N, C, H, W = 2, 4, 16, 16
    key = jax.random.PRNGKey(0)
    k_x, k_w1, k_w2, k_w3 = jax.random.split(key, 4)

    x = jax.random.normal(k_x, (N, C, H, W), dtype=jnp.float32)
    params = dict(
        w1=(0.1 * jax.random.normal(k_w1, (C, C, 3, 3))).astype(jnp.float32),
        w2=(0.1 * jax.random.normal(k_w2, (C, C, 3, 3))).astype(jnp.float32),
        wout=(0.1 * jax.random.normal(k_w3, (C, C, 3, 3))).astype(jnp.float32),
        gamma=jnp.ones((C,), jnp.float32),         # GroupNorm weight
        beta=jnp.zeros((C,), jnp.float32),         # GroupNorm bias
        alpha=jnp.full((C,), 0.25, jnp.float32),   # nn.PReLU(channel) init
    )

    fwd = jax.jit(brb_forward)
    out = jax.block_until_ready(fwd(params, x))

    assert out.shape == (N, C, H, W), out.shape
    assert bool(jnp.all(jnp.isfinite(out)))

    ref = brb_reference(params, x)
    max_err = float(jnp.max(jnp.abs(out - ref)))
    assert max_err < 1e-2, f"mismatch vs reference: {max_err}"

    print("KERNEL_OK")
</pallas_src>

<mosaic_0001>
module attributes {stable_mosaic.version = 11 : i64} {
  func.func @kernel(%arg0: i32, %arg1: memref<1x4x16x16xf32, #tpu.memory_space<vmem>>, %arg2: memref<3x9x4x4xf32, #tpu.memory_space<vmem>>, %arg3: memref<4x3xf32, #tpu.memory_space<vmem>>, %arg4: memref<1x4x288xf32, #tpu.memory_space<vmem>>, %arg5: memref<4x326xf32, #tpu.memory_space<vmem>>, %arg6: memref<4x326xf32, #tpu.memory_space<vmem>>, %arg7: memref<4x326xf32, #tpu.memory_space<vmem>>) attributes {dimension_semantics = [#tpu.dimension_semantics<parallel>], iteration_bounds = array<i64: 2>, scalar_prefetch = 0 : i64, scratch_operands = 3 : i64, tpu.core_type = #tpu.core_type<tc>, window_params = [{transform_indices = @transform_0, window_bounds = array<i64: 1, 4, 16, 16>}, {pipeline_mode = #tpu.pipeline_mode<synchronous>, transform_indices = @transform_1, window_bounds = array<i64: 3, 9, 4, 4>}, {pipeline_mode = #tpu.pipeline_mode<synchronous>, transform_indices = @transform_2, window_bounds = array<i64: 4, 3>}, {transform_indices = @transform_3, window_bounds = array<i64: 1, 4, 288>}]} {
    %cst = arith.constant 0.000000e+00 : f32
    %0 = vector.broadcast %cst : f32 to vector<4x326xf32>
    %c0 = arith.constant 0 : index
    %c0_0 = arith.constant 0 : index
    %1 = vector.load %arg5[%c0, %c0_0] : memref<4x326xf32, #tpu.memory_space<vmem>>, vector<4x326xf32>
    tpu.vector_store %arg5[%c0, %c0_0], %0 {strides = array<i32>} : memref<4x326xf32, #tpu.memory_space<vmem>>, vector<4x326xf32>,
    %cst_1 = arith.constant 0.000000e+00 : f32
    %2 = vector.broadcast %cst_1 : f32 to vector<4x326xf32>
    %c0_2 = arith.constant 0 : index
    %c0_3 = arith.constant 0 : index
    %3 = vector.load %arg6[%c0_2, %c0_3] : memref<4x326xf32, #tpu.memory_space<vmem>>, vector<4x326xf32>
    tpu.vector_store %arg6[%c0_2, %c0_3], %2 {strides = array<i32>} : memref<4x326xf32, #tpu.memory_space<vmem>>, vector<4x326xf32>,
    %cst_4 = arith.constant 0.000000e+00 : f32
    %4 = vector.broadcast %cst_4 : f32 to vector<4x326xf32>
    %c0_5 = arith.constant 0 : index
    %c0_6 = arith.constant 0 : index
    %5 = vector.load %arg7[%c0_5, %c0_6] : memref<4x326xf32, #tpu.memory_space<vmem>>, vector<4x326xf32>
    tpu.vector_store %arg7[%c0_5, %c0_6], %4 {strides = array<i32>} : memref<4x326xf32, #tpu.memory_space<vmem>>, vector<4x326xf32>,
    %c0_7 = arith.constant 0 : index
    %c0_8 = arith.constant 0 : index
    %c0_9 = arith.constant 0 : index
    %c0_10 = arith.constant 0 : index
    %6 = vector.load %arg1[%c0_7, %c0_8, %c0_9, %c0_10] : memref<1x4x16x16xf32, #tpu.memory_space<vmem>>, vector<1x4x16x16xf32>
    %7 = vector.shape_cast %6 : vector<1x4x16x16xf32> to vector<4x16x16xf32>
    %8 = vector.extract_strided_slice %7 {offsets = [0, 0, 0], sizes = [4, 1, 16], strides = [1, 1, 1]} : vector<4x16x16xf32> to vector<4x1x16xf32>
    %9 = vector.shape_cast %8 : vector<4x1x16xf32> to vector<4x16xf32>
    %c0_11 = arith.constant 0 : index
    %c19 = arith.constant 19 : index
    %10 = vector.load %arg5[%c0_11, %c19] : memref<4x326xf32, #tpu.memory_space<vmem>>, vector<4x16xf32>
    tpu.vector_store %arg5[%c0_11, %c19], %9 {strides = array<i32>} : memref<4x326xf32, #tpu.memory_space<vmem>>, vector<4x16xf32>,
    %11 = vector.extract_strided_slice %7 {offsets = [0, 1, 0], sizes = [4, 1, 16], strides = [1, 1, 1]} : vector<4x16x16xf32> to vector<4x1x16xf32>
    %12 = vector.shape_cast %11 : vector<4x1x16xf32> to vector<4x16xf32>
    %c0_12 = arith.constant 0 : index
    %c37 = arith.constant 37 : index
    %13 = vector.load %arg5[%c0_12, %c37] : memref<4x326xf32, #tpu.memory_space<vmem>>, vector<4x16xf32>
    tpu.vector_store %arg5[%c0_12, %c37], %12 {strides = array<i32>} : memref<4x326xf32, #tpu.memory_space<vmem>>, vector<4x16xf32>,
    %14 = vector.extract_strided_slice %7 {offsets = [0, 2, 0], sizes = [4, 1, 16], strides = [1, 1, 1]} : vector<4x16x16xf32> to vector<4x1x16xf32>
    %15 = vector.shape_cast %14 : vector<4x1x16xf32> to vector<4x16xf32>
    %c0_13 = arith.constant 0 : index
    %c55 = arith.constant 55 : index
    %16 = vector.load %arg5[%c0_13, %c55] : memref<4x326xf32, #tpu.memory_space<vmem>>, vector<4x16xf32>
    tpu.vector_store %arg5[%c0_13, %c55], %15 {strides = array<i32>} : memref<4x326xf32, #tpu.memory_space<vmem>>, vector<4x16xf32>,
    %17 = vector.extract_strided_slice %7 {offsets = [0, 3, 0], sizes = [4, 1, 16], strides = [1, 1, 1]} : vector<4x16x16xf32> to vector<4x1x16xf32>
    %18 = vector.shape_cast %17 : vector<4x1x16xf32> to vector<4x16xf32>
    %c0_14 = arith.constant 0 : index
    %c73 = arith.constant 73 : index
    %19 = vector.load %arg5[%c0_14, %c73] : memref<4x326xf32, #tpu.memory_space<vmem>>, vector<4x16xf32>
    tpu.vector_store %arg5[%c0_14, %c73], %18 {strides = array<i32>} : memref<4x326xf32, #tpu.memory_space<vmem>>, vector<4x16xf32>,
    %20 = vector.extract_strided_slice %7 {offsets = [0, 4, 0], sizes = [4, 1, 16], strides = [1, 1, 1]} : vector<4x16x16xf32> to vector<4x1x16xf32>
    %21 = vector.shape_cast %20 : vector<4x1x16xf32> to vector<4x16xf32>
    %c0_15 = arith.constant 0 : index
    %c91 = arith.constant 91 : index
    %22 = vector.load %arg5[%c0_15, %c91] : memref<4x326xf32, #tpu.memory_space<vmem>>, vector<4x16xf32>
    tpu.vector_store %arg5[%c0_15, %c91], %21 {strides = array<i32>} : memref<4x326xf32, #tpu.memory_space<vmem>>, vector<4x16xf32>,
    %23 = vector.extract_strided_slice %7 {offsets = [0, 5, 0], sizes = [4, 1, 16], strides = [1, 1, 1]} : vector<4x16x16xf32> to vector<4x1x16xf32>
    %24 = vector.shape_cast %23 : vector<4x1x16xf32> to vector<4x16xf32>
    %c0_16 = arith.constant 0 : index
    %c109 = arith.constant 109 : index
    %25 = vector.load %arg5[%c0_16, %c109] : memref<4x326xf32, #tpu.memory_space<vmem>>, vector<4x16xf32>
    tpu.vector_store %arg5[%c0_16, %c109], %24 {strides = array<i32>} : memref<4x326xf32, #tpu.memory_space<vmem>>, vector<4x16xf32>,
    %26 = vector.extract_strided_slice %7 {offsets = [0, 6, 0], sizes = [4, 1, 16], strides = [1, 1, 1]} : vector<4x16x16xf32> to vector<4x1x16xf32>
    %27 = vector.shape_cast %26 : vector<4x1x16xf32> to vector<4x16xf32>
    %c0_17 = arith.constant 0 : index
    %c127 = arith.constant 127 : index
    %28 = vector.load %arg5[%c0_17, %c127] : memref<4x326xf32, #tpu.memory_space<vmem>>, vector<4x16xf32>
    tpu.vector_store %arg5[%c0_17, %c127], %27 {strides = array<i32>} : memref<4x326xf32, #tpu.memory_space<vmem>>, vector<4x16xf32>,
    %29 = vector.extract_strided_slice %7 {offsets = [0, 7, 0], sizes = [4, 1, 16], strides = [1, 1, 1]} : vector<4x16x16xf32> to vector<4x1x16xf32>
    %30 = vector.shape_cast %29 : vector<4x1x16xf32> to vector<4x16xf32>
    %c0_18 = arith.constant 0 : index
    %c145 = arith.constant 145 : index
    %31 = vector.load %arg5[%c0_18, %c145] : memref<4x326xf32, #tpu.memory_space<vmem>>, vector<4x16xf32>
    tpu.vector_store %arg5[%c0_18, %c145], %30 {strides = array<i32>} : memref<4x326xf32, #tpu.memory_space<vmem>>, vector<4x16xf32>,
    %32 = vector.extract_strided_slice %7 {offsets = [0, 8, 0], sizes = [4, 1, 16], strides = [1, 1, 1]} : vector<4x16x16xf32> to vector<4x1x16xf32>
    %33 = vector.shape_cast %32 : vector<4x1x16xf32> to vector<4x16xf32>
    %c0_19 = arith.constant 0 : index
    %c163 = arith.constant 163 : index
    %34 = vector.load %arg5[%c0_19, %c163] : memref<4x326xf32, #tpu.memory_space<vmem>>, vector<4x16xf32>
    tpu.vector_store %arg5[%c0_19, %c163], %33 {strides = array<i32>} : memref<4x326xf32, #tpu.memory_space<vmem>>, vector<4x16xf32>,
    %35 = vector.extract_strided_slice %7 {offsets = [0, 9, 0], sizes = [4, 1, 16], strides = [1, 1, 1]} : vector<4x16x16xf32> to vector<4x1x16xf32>
    %36 = vector.shape_cast %35 : vector<4x1x16xf32> to vector<4x16xf32>
    %c0_20 = arith.constant 0 : index
    %c181 = arith.constant 181 : index
    %37 = vector.load %arg5[%c0_20, %c181] : memref<4x326xf32, #tpu.memory_space<vmem>>, vector<4x16xf32>
    tpu.vector_store %arg5[%c0_20, %c181], %36 {strides = array<i32>} : memref<4x326xf32, #tpu.memory_space<vmem>>, vector<4x16xf32>,
    %38 = vector.extract_strided_slice %7 {offsets = [0, 10, 0], sizes = [4, 1, 16], strides = [1, 1, 1]} : vector<4x16x16xf32> to vector<4x1x16xf32>
    %39 = vector.shape_cast %38 : vector<4x1x16xf32> to vector<4x16xf32>
    %c0_21 = arith.constant 0 : index
    %c199 = arith.constant 199 : index
    %40 = vector.load %arg5[%c0_21, %c199] : memref<4x326xf32, #tpu.memory_space<vmem>>, vector<4x16xf32>
    tpu.vector_store %arg5[%c0_21, %c199], %39 {strides = array<i32>} : memref<4x326xf32, #tpu.memory_space<vmem>>, vector<4x16xf32>,
    %41 = vector.extract_strided_slice %7 {offsets = [0, 11, 0], sizes = [4, 1, 16], strides = [1, 1, 1]} : vector<4x16x16xf32> to vector<4x1x16xf32>
    %42 = vector.shape_cast %41 : vector<4x1x16xf32> to vector<4x16xf32>
    %c0_22 = arith.constant 0 : index
    %c217 = arith.constant 217 : index
    %43 = vector.load %arg5[%c0_22, %c217] : memref<4x326xf32, #tpu.memory_space<vmem>>, vector<4x16xf32>
    tpu.vector_store %arg5[%c0_22, %c217], %42 {strides = array<i32>} : memref<4x326xf32, #tpu.memory_space<vmem>>, vector<4x16xf32>,
    %44 = vector.extract_strided_slice %7 {offsets = [0, 12, 0], sizes = [4, 1, 16], strides = [1, 1, 1]} : vector<4x16x16xf32> to vector<4x1x16xf32>
    %45 = vector.shape_cast %44 : vector<4x1x16xf32> to vector<4x16xf32>
    %c0_23 = arith.constant 0 : index
    %c235 = arith.constant 235 : index
    %46 = vector.load %arg5[%c0_23, %c235] : memref<4x326xf32, #tpu.memory_space<vmem>>, vector<4x16xf32>
    tpu.vector_store %arg5[%c0_23, %c235], %45 {strides = array<i32>} : memref<4x326xf32, #tpu.memory_space<vmem>>, vector<4x16xf32>,
    %47 = vector.extract_strided_slice %7 {offsets = [0, 13, 0], sizes = [4, 1, 16], strides = [1, 1, 1]} : vector<4x16x16xf32> to vector<4x1x16xf32>
    %48 = vector.shape_cast %47 : vector<4x1x16xf32> to vector<4x16xf32>
    %c0_24 = arith.constant 0 : index
    %c253 = arith.constant 253 : index
    %49 = vector.load %arg5[%c0_24, %c253] : memref<4x326xf32, #tpu.memory_space<vmem>>, vector<4x16xf32>
    tpu.vector_store %arg5[%c0_24, %c253], %48 {strides = array<i32>} : memref<4x326xf32, #tpu.memory_space<vmem>>, vector<4x16xf32>,
    %50 = vector.extract_strided_slice %7 {offsets = [0, 14, 0], sizes = [4, 1, 16], strides = [1, 1, 1]} : vector<4x16x16xf32> to vector<4x1x16xf32>
    %51 = vector.shape_cast %50 : vector<4x1x16xf32> to vector<4x16xf32>
    %c0_25 = arith.constant 0 : index
    %c271 = arith.constant 271 : index
    %52 = vector.load %arg5[%c0_25, %c271] : memref<4x326xf32, #tpu.memory_space<vmem>>, vector<4x16xf32>
    tpu.vector_store %arg5[%c0_25, %c271], %51 {strides = array<i32>} : memref<4x326xf32, #tpu.memory_space<vmem>>, vector<4x16xf32>,
    %53 = vector.extract_strided_slice %7 {offsets = [0, 15, 0], sizes = [4, 1, 16], strides = [1, 1, 1]} : vector<4x16x16xf32> to vector<4x1x16xf32>
    %54 = vector.shape_cast %53 : vector<4x1x16xf32> to vector<4x16xf32>
    %c0_26 = arith.constant 0 : index
    %c289 = arith.constant 289 : index
    %55 = vector.load %arg5[%c0_26, %c289] : memref<4x326xf32, #tpu.memory_space<vmem>>, vector<4x16xf32>
    tpu.vector_store %arg5[%c0_26, %c289], %54 {strides = array<i32>} : memref<4x326xf32, #tpu.memory_space<vmem>>, vector<4x16xf32>,
    %56 = tpu.iota {dimensions = array<i32: 1>} : vector<4x288xi32>
    %c18_i32 = arith.constant 18 : i32
    %c0_i32 = arith.constant 0 : i32
    %57 = arith.cmpi eq, %c18_i32, %c0_i32 : i32
    %c1_i32 = arith.constant 1 : i32
    %58 = arith.select %57, %c1_i32, %c18_i32 : i32
    %59 = vector.broadcast %58 : i32 to vector<4x288xi32>
    %60 = arith.remsi %56, %59 : vector<4x288xi32>
    %c0_i32_27 = arith.constant 0 : i32
    %61 = vector.broadcast %c0_i32_27 : i32 to vector<4x288xi32>
    %62 = arith.cmpi ne, %60, %61 : vector<4x288xi32>
    %c0_i32_28 = arith.constant 0 : i32
    %63 = vector.broadcast %c0_i32_28 : i32 to vector<4x288xi32>
    %64 = arith.cmpi slt, %60, %63 : vector<4x288xi32>
    %c0_i32_29 = arith.constant 0 : i32
    %65 = arith.cmpi slt, %58, %c0_i32_29 : i32
    %66 = vector.broadcast %65 : i1 to vector<4x288xi1>
    %67 = vector.broadcast %66 : vector<4x288xi1> to vector<4x288xi1>
    %68 = arith.xori %64, %67 : vector<4x288xi1>
    %69 = arith.andi %68, %62 : vector<4x288xi1>
    %70 = vector.broadcast %58 : i32 to vector<4x288xi32>
    %71 = arith.addi %60, %70 : vector<4x288xi32>
    %72 = arith.select %69, %71, %60 : vector<4x288xi1>, vector<4x288xi32>
    %c16_i32 = arith.constant 16 : i32
    %73 = vector.broadcast %c16_i32 : i32 to vector<4x288xi32>
    %74 = arith.cmpi slt, %72, %73 : vector<4x288xi32>
    %c0_30 = arith.constant 0 : index
    %c0_31 = arith.constant 0 : index
    %75 = vector.load %arg3[%c0_30, %c0_31] : memref<4x3xf32, #tpu.memory_space<vmem>>, vector<4x1xf32>
    %c0_32 = arith.constant 0 : index
    %c1 = arith.constant 1 : index
    %76 = vector.load %arg3[%c0_32, %c1] : memref<4x3xf32, #tpu.memory_space<vmem>>, vector<4x1xf32>
    %c0_33 = arith.constant 0 : index
    %c2 = arith.constant 2 : index
    %77 = vector.load %arg3[%c0_33, %c2] : memref<4x3xf32, #tpu.memory_space<vmem>>, vector<4x1xf32>
    %cst_34 = arith.constant 0.000000e+00 : f32
    %78 = vector.broadcast %cst_34 : f32 to vector<4x288xf32>
    %c0_35 = arith.constant 0 : index
    %c0_36 = arith.constant 0 : index
    %79 = vector.load %arg5[%c0_35, %c0_36] : memref<4x326xf32, #tpu.memory_space<vmem>>, vector<4x288xf32>
    %c0_37 = arith.constant 0 : index
    %c0_38 = arith.constant 0 : index
    %c0_39 = arith.constant 0 : index
    %c0_40 = arith.constant 0 : index
    %80 = vector.load %arg2[%c0_37, %c0_38, %c0_39, %c0_40] : memref<3x9x4x4xf32, #tpu.memory_space<vmem>>, vector<1x1x4x4xf32>
    %81 = vector.shape_cast %80 : vector<1x1x4x4xf32> to vector<4x4xf32>
    %cst_41 = arith.constant dense<0.000000e+00> : vector<4x288xf32>
    %82 = tpu.matmul %81, %79, %cst_41 {dimension_numbers = #tpu.dot_dimension_numbers<[1], [0], [0], [1], [0, 0, 1, 1], [], []>} : vector<4x4xf32>, vector<4x288xf32>, vector<4x288xf32> -> vector<4x288xf32>
    %83 = arith.addf %78, %82 : vector<4x288xf32>
    %c0_42 = arith.constant 0 : index
    %c1_43 = arith.constant 1 : index
    %84 = vector.load %arg5[%c0_42, %c1_43] : memref<4x326xf32, #tpu.memory_space<vmem>>, vector<4x288xf32>
    %c0_44 = arith.constant 0 : index
    %c1_45 = arith.constant 1 : index
    %c0_46 = arith.constant 0 : index
    %c0_47 = arith.constant 0 : index
    %85 = vector.load %arg2[%c0_44, %c1_45, %c0_46, %c0_47] : memref<3x9x4x4xf32, #tpu.memory_space<vmem>>, vector<1x1x4x4xf32>
    %86 = vector.shape_cast %85 : vector<1x1x4x4xf32> to vector<4x4xf32>
    %cst_48 = arith.constant dense<0.000000e+00> : vector<4x288xf32>
    %87 = tpu.matmul %86, %84, %cst_48 {dimension_numbers = #tpu.dot_dimension_numbers<[1], [0], [0], [1], [0, 0, 1, 1], [], []>} : vector<4x4xf32>, vector<4x288xf32>, vector<4x288xf32> -> vector<4x288xf32>
    %88 = arith.addf %83, %87 : vector<4x288xf32>
    %c0_49 = arith.constant 0 : index
    %c2_50 = arith.constant 2 : index
    %89 = vector.load %arg5[%c0_49, %c2_50] : memref<4x326xf32, #tpu.memory_space<vmem>>, vector<4x288xf32>
    %c0_51 = arith.constant 0 : index
    %c2_52 = arith.constant 2 : index
    %c0_53 = arith.constant 0 : index
    %c0_54 = arith.constant 0 : index
    %90 = vector.load %arg2[%c0_51, %c2_52, %c0_53, %c0_54] : memref<3x9x4x4xf32, #tpu.memory_space<vmem>>, vector<1x1x4x4xf32>
    %91 = vector.shape_cast %90 : vector<1x1x4x4xf32> to vector<4x4xf32>
    %cst_55 = arith.constant dense<0.000000e+00> : vector<4x288xf32>
    %92 = tpu.matmul %91, %89, %cst_55 {dimension_numbers = #tpu.dot_dimension_numbers<[1], [0], [0], [1], [0, 0, 1, 1], [], []>} : vector<4x4xf32>, vector<4x288xf32>, vector<4x288xf32> -> vector<4x288xf32>
    %93 = arith.addf %88, %92 : vector<4x288xf32>
    %c0_56 = arith.constant 0 : index
    %c18 = arith.constant 18 : index
    %94 = vector.load %arg5[%c0_56, %c18] : memref<4x326xf32, #tpu.memory_space<vmem>>, vector<4x288xf32>
    %c0_57 = arith.constant 0 : index
    %c3 = arith.constant 3 : index
    %c0_58 = arith.constant 0 : index
    %c0_59 = arith.constant 0 : index
    %95 = vector.load %arg2[%c0_57, %c3, %c0_58, %c0_59] : memref<3x9x4x4xf32, #tpu.memory_space<vmem>>, vector<1x1x4x4xf32>
    %96 = vector.shape_cast %95 : vector<1x1x4x4xf32> to vector<4x4xf32>
    %cst_60 = arith.constant dense<0.000000e+00> : vector<4x288xf32>
    %97 = tpu.matmul %96, %94, %cst_60 {dimension_numbers = #tpu.dot_dimension_numbers<[1], [0], [0], [1], [0, 0, 1, 1], [], []>} : vector<4x4xf32>, vector<4x288xf32>, vector<4x288xf32> -> vector<4x288xf32>
    %98 = arith.addf %93, %97 : vector<4x288xf32>
    %c0_61 = arith.constant 0 : index
    %c19_62 = arith.constant 19 : index
    %99 = vector.load %arg5[%c0_61, %c19_62] : memref<4x326xf32, #tpu.memory_space<vmem>>, vector<4x288xf32>
    %c0_63 = arith.constant 0 : index
    %c4 = arith.constant 4 : index
    %c0_64 = arith.constant 0 : index
    %c0_65 = arith.constant 0 : index
    %100 = vector.load %arg2[%c0_63, %c4, %c0_64, %c0_65] : memref<3x9x4x4xf32, #tpu.memory_space<vmem>>, vector<1x1x4x4xf32>
    %101 = vector.shape_cast %100 : vector<1x1x4x4xf32> to vector<4x4xf32>
    %cst_66 = arith.constant dense<0.000000e+00> : vector<4x288xf32>
    %102 = tpu.matmul %101, %99, %cst_66 {dimension_numbers = #tpu.dot_dimension_numbers<[1], [0], [0], [1], [0, 0, 1, 1], [], []>} : vector<4x4xf32>, vector<4x288xf32>, vector<4x288xf32> -> vector<4x288xf32>
    %103 = arith.addf %98, %102 : vector<4x288xf32>
    %c0_67 = arith.constant 0 : index
    %c20 = arith.constant 20 : index
    %104 = vector.load %arg5[%c0_67, %c20] : memref<4x326xf32, #tpu.memory_space<vmem>>, vector<4x288xf32>
    %c0_68 = arith.constant 0 : index
    %c5 = arith.constant 5 : index
    %c0_69 = arith.constant 0 : index
    %c0_70 = arith.constant 0 : index
    %105 = vector.load %arg2[%c0_68, %c5, %c0_69, %c0_70] : memref<3x9x4x4xf32, #tpu.memory_space<vmem>>, vector<1x1x4x4xf32>
    %106 = vector.shape_cast %105 : vector<1x1x4x4xf32> to vector<4x4xf32>
    %cst_71 = arith.constant dense<0.000000e+00> : vector<4x288xf32>
    %107 = tpu.matmul %106, %104, %cst_71 {dimension_numbers = #tpu.dot_dimension_numbers<[1], [0], [0], [1], [0, 0, 1, 1], [], []>} : vector<4x4xf32>, vector<4x288xf32>, vector<4x288xf32> -> vector<4x288xf32>
    %108 = arith.addf %103, %107 : vector<4x288xf32>
    %c0_72 = arith.constant 0 : index
    %c36 = arith.constant 36 : index
    %109 = vector.load %arg5[%c0_72, %c36] : memref<4x326xf32, #tpu.memory_space<vmem>>, vector<4x288xf32>
    %c0_73 = arith.constant 0 : index
    %c6 = arith.constant 6 : index
    %c0_74 = arith.constant 0 : index
    %c0_75 = arith.constant 0 : index
    %110 = vector.load %arg2[%c0_73, %c6, %c0_74, %c0_75] : memref<3x9x4x4xf32, #tpu.memory_space<vmem>>, vector<1x1x4x4xf32>
    %111 = vector.shape_cast %110 : vector<1x1x4x4xf32> to vector<4x4xf32>
    %cst_76 = arith.constant dense<0.000000e+00> : vector<4x288xf32>
    %112 = tpu.matmul %111, %109, %cst_76 {dimension_numbers = #tpu.dot_dimension_numbers<[1], [0], [0], [1], [0, 0, 1, 1], [], []>} : vector<4x4xf32>, vector<4x288xf32>, vector<4x288xf32> -> vector<4x288xf32>
    %113 = arith.addf %108, %112 : vector<4x288xf32>
    %c0_77 = arith.constant 0 : index
    %c37_78 = arith.constant 37 : index
    %114 = vector.load %arg5[%c0_77, %c37_78] : memref<4x326xf32, #tpu.memory_space<vmem>>, vector<4x288xf32>
    %c0_79 = arith.constant 0 : index
    %c7 = arith.constant 7 : index
    %c0_80 = arith.constant 0 : index
    %c0_81 = arith.constant 0 : index
    %115 = vector.load %arg2[%c0_79, %c7, %c0_80, %c0_81] : memref<3x9x4x4xf32, #tpu.memory_space<vmem>>, vector<1x1x4x4xf32>
    %116 = vector.shape_cast %115 : vector<1x1x4x4xf32> to vector<4x4xf32>
    %cst_82 = arith.constant dense<0.000000e+00> : vector<4x288xf32>
    %117 = tpu.matmul %116, %114, %cst_82 {dimension_numbers = #tpu.dot_dimension_numbers<[1], [0], [0], [1], [0, 0, 1, 1], [], []>} : vector<4x4xf32>, vector<4x288xf32>, vector<4x288xf32> -> vector<4x288xf32>
    %118 = arith.addf %113, %117 : vector<4x288xf32>
    %c0_83 = arith.constant 0 : index
    %c38 = arith.constant 38 : index
    %119 = vector.load %arg5[%c0_83, %c38] : memref<4x326xf32, #tpu.memory_space<vmem>>, vector<4x288xf32>
    %c0_84 = arith.constant 0 : index
    %c8 = arith.constant 8 : index
    %c0_85 = arith.constant 0 : index
    %c0_86 = arith.constant 0 : index
    %120 = vector.load %arg2[%c0_84, %c8, %c0_85, %c0_86] : memref<3x9x4x4xf32, #tpu.memory_space<vmem>>, vector<1x1x4x4xf32>
    %121 = vector.shape_cast %120 : vector<1x1x4x4xf32> to vector<4x4xf32>
    %cst_87 = arith.constant dense<0.000000e+00> : vector<4x288xf32>
    %122 = tpu.matmul %121, %119, %cst_87 {dimension_numbers = #tpu.dot_dimension_numbers<[1], [0], [0], [1], [0, 0, 1, 1], [], []>} : vector<4x4xf32>, vector<4x288xf32>, vector<4x288xf32> -> vector<4x288xf32>
    %123 = arith.addf %118, %122 : vector<4x288xf32>
    %cst_88 = arith.constant 0.000000e+00 : f32
    %124 = vector.broadcast %cst_88 : f32 to vector<4x288xf32>
    %125 = arith.select %74, %123, %124 : vector<4x288xi1>, vector<4x288xf32>
    %126 = vector.shape_cast %125 : vector<4x288xf32> to vector<1x4x288xf32>
    %cst_89 = arith.constant dense<0.000000e+00> : vector<1xf32>
    %127 = vector.multi_reduction <add>, %126, %cst_89 [1, 2] : vector<1x4x288xf32> to vector<1xf32>
    %128 = vector.shape_cast %127 : vector<1xf32> to vector<1x1x1xf32>
    %129 = vector.extract %128[0, 0, 0] : f32 from vector<1x1x1xf32>
    %130 = vector.broadcast %129 : f32 to vector<1x1xf32>
    %131 = arith.mulf %125, %125 : vector<4x288xf32>
    %132 = vector.shape_cast %131 : vector<4x288xf32> to vector<1x4x288xf32>
    %cst_90 = arith.constant dense<0.000000e+00> : vector<1xf32>
    %133 = vector.multi_reduction <add>, %132, %cst_90 [1, 2] : vector<1x4x288xf32> to vector<1xf32>
    %134 = vector.shape_cast %133 : vector<1xf32> to vector<1x1x1xf32>
    %135 = vector.extract %134[0, 0, 0] : f32 from vector<1x1x1xf32>
    %136 = vector.broadcast %135 : f32 to vector<1x1xf32>
    %cst_91 = arith.constant 9.765625E-4 : f32
    %137 = vector.broadcast %cst_91 : f32 to vector<1x1xf32>
    %138 = arith.mulf %130, %137 : vector<1x1xf32>
    %cst_92 = arith.constant 9.765625E-4 : f32
    %139 = vector.broadcast %cst_92 : f32 to vector<1x1xf32>
    %140 = arith.mulf %136, %139 : vector<1x1xf32>
    %141 = arith.mulf %138, %138 : vector<1x1xf32>
    %142 = arith.subf %140, %141 : vector<1x1xf32>
    %cst_93 = arith.constant 9.99999974E-6 : f32
    %143 = vector.broadcast %cst_93 : f32 to vector<1x1xf32>
    %144 = arith.addf %142, %143 : vector<1x1xf32>
    %145 = math.rsqrt %144 : vector<1x1xf32>
    %146 = vector.broadcast %145 : vector<1x1xf32> to vector<4x1xf32>
    %147 = arith.mulf %75, %146 : vector<4x1xf32>
    %148 = vector.broadcast %138 : vector<1x1xf32> to vector<4x1xf32>
    %149 = arith.mulf %148, %147 : vector<4x1xf32>
    %150 = arith.subf %76, %149 : vector<4x1xf32>
    %151 = vector.broadcast %147 : vector<4x1xf32> to vector<4x288xf32>
    %152 = arith.mulf %125, %151 : vector<4x288xf32>
    %153 = vector.broadcast %150 : vector<4x1xf32> to vector<4x288xf32>
    %154 = arith.addf %152, %153 : vector<4x288xf32>
    %cst_94 = arith.constant 0.000000e+00 : f32
    %155 = vector.broadcast %cst_94 : f32 to vector<4x288xf32>
    %156 = arith.cmpf oge, %154, %155 : vector<4x288xf32>
    %157 = vector.broadcast %77 : vector<4x1xf32> to vector<4x288xf32>
    %158 = arith.mulf %157, %154 : vector<4x288xf32>
    %159 = arith.select %156, %154, %158 : vector<4x288xi1>, vector<4x288xf32>
    %cst_95 = arith.constant 0.000000e+00 : f32
    %160 = vector.broadcast %cst_95 : f32 to vector<4x288xf32>
    %161 = arith.select %74, %159, %160 : vector<4x288xi1>, vector<4x288xf32>
    %c0_96 = arith.constant 0 : index
    %c19_97 = arith.constant 19 : index
    %162 = vector.load %arg6[%c0_96, %c19_97] : memref<4x326xf32, #tpu.memory_space<vmem>>, vector<4x288xf32>
    tpu.vector_store %arg6[%c0_96, %c19_97], %161 {strides = array<i32>} : memref<4x326xf32, #tpu.memory_space<vmem>>, vector<4x288xf32>,
    %cst_98 = arith.constant 0.000000e+00 : f32
    %163 = vector.broadcast %cst_98 : f32 to vector<4x288xf32>
    %c0_99 = arith.constant 0 : index
    %c0_100 = arith.constant 0 : index
    %164 = vector.load %arg6[%c0_99, %c0_100] : memref<4x326xf32, #tpu.memory_space<vmem>>, vector<4x288xf32>
    %c1_101 = arith.constant 1 : index
    %c0_102 = arith.constant 0 : index
    %c0_103 = arith.constant 0 : index
    %c0_104 = arith.constant 0 : index
    %165 = vector.load %arg2[%c1_101, %c0_102, %c0_103, %c0_104] : memref<3x9x4x4xf32, #tpu.memory_space<vmem>>, vector<1x1x4x4xf32>
    %166 = vector.shape_cast %165 : vector<1x1x4x4xf32> to vector<4x4xf32>
    %cst_105 = arith.constant dense<0.000000e+00> : vector<4x288xf32>
    %167 = tpu.matmul %166, %164, %cst_105 {dimension_numbers = #tpu.dot_dimension_numbers<[1], [0], [0], [1], [0, 0, 1, 1], [], []>} : vector<4x4xf32>, vector<4x288xf32>, vector<4x288xf32> -> vector<4x288xf32>
    %168 = arith.addf %163, %167 : vector<4x288xf32>
    %c0_106 = arith.constant 0 : index
    %c1_107 = arith.constant 1 : index
    %169 = vector.load %arg6[%c0_106, %c1_107] : memref<4x326xf32, #tpu.memory_space<vmem>>, vector<4x288xf32>
    %c1_108 = arith.constant 1 : index
    %c1_109 = arith.constant 1 : index
    %c0_110 = arith.constant 0 : index
    %c0_111 = arith.constant 0 : index
    %170 = vector.load %arg2[%c1_108, %c1_109, %c0_110, %c0_111] : memref<3x9x4x4xf32, #tpu.memory_space<vmem>>, vector<1x1x4x4xf32>
    %171 = vector.shape_cast %170 : vector<1x1x4x4xf32> to vector<4x4xf32>
    %cst_112 = arith.constant dense<0.000000e+00> : vector<4x288xf32>
    %172 = tpu.matmul %171, %169, %cst_112 {dimension_numbers = #tpu.dot_dimension_numbers<[1], [0], [0], [1], [0, 0, 1, 1], [], []>} : vector<4x4xf32>, vector<4x288xf32>, vector<4x288xf32> -> vector<4x288xf32>
    %173 = arith.addf %168, %172 : vector<4x288xf32>
    %c0_113 = arith.constant 0 : index
    %c2_114 = arith.constant 2 : index
    %174 = vector.load %arg6[%c0_113, %c2_114] : memref<4x326xf32, #tpu.memory_space<vmem>>, vector<4x288xf32>
    %c1_115 = arith.constant 1 : index
    %c2_116 = arith.constant 2 : index
    %c0_117 = arith.constant 0 : index
    %c0_118 = arith.constant 0 : index
    %175 = vector.load %arg2[%c1_115, %c2_116, %c0_117, %c0_118] : memref<3x9x4x4xf32, #tpu.memory_space<vmem>>, vector<1x1x4x4xf32>
    %176 = vector.shape_cast %175 : vector<1x1x4x4xf32> to vector<4x4xf32>
    %cst_119 = arith.constant dense<0.000000e+00> : vector<4x288xf32>
    %177 = tpu.matmul %176, %174, %cst_119 {dimension_numbers = #tpu.dot_dimension_numbers<[1], [0], [0], [1], [0, 0, 1, 1], [], []>} : vector<4x4xf32>, vector<4x288xf32>, vector<4x288xf32> -> vector<4x288xf32>
    %178 = arith.addf %173, %177 : vector<4x288xf32>
    %c0_120 = arith.constant 0 : index
    %c18_121 = arith.constant 18 : index
    %179 = vector.load %arg6[%c0_120, %c18_121] : memref<4x326xf32, #tpu.memory_space<vmem>>, vector<4x288xf32>
    %c1_122 = arith.constant 1 : index
    %c3_123 = arith.constant 3 : index
    %c0_124 = arith.constant 0 : index
    %c0_125 = arith.constant 0 : index
    %180 = vector.load %arg2[%c1_122, %c3_123, %c0_124, %c0_125] : memref<3x9x4x4xf32, #tpu.memory_space<vmem>>, vector<1x1x4x4xf32>
    %181 = vector.shape_cast %180 : vector<1x1x4x4xf32> to vector<4x4xf32>
    %cst_126 = arith.constant dense<0.000000e+00> : vector<4x288xf32>
    %182 = tpu.matmul %181, %179, %cst_126 {dimension_numbers = #tpu.dot_dimension_numbers<[1], [0], [0], [1], [0, 0, 1, 1], [], []>} : vector<4x4xf32>, vector<4x288xf32>, vector<4x288xf32> -> vector<4x288xf32>
    %183 = arith.addf %178, %182 : vector<4x288xf32>
    %c0_127 = arith.constant 0 : index
    %c19_128 = arith.constant 19 : index
    %184 = vector.load %arg6[%c0_127, %c19_128] : memref<4x326xf32, #tpu.memory_space<vmem>>, vector<4x288xf32>
    %c1_129 = arith.constant 1 : index
    %c4_130 = arith.constant 4 : index
    %c0_131 = arith.constant 0 : index
    %c0_132 = arith.constant 0 : index
    %185 = vector.load %arg2[%c1_129, %c4_130, %c0_131, %c0_132] : memref<3x9x4x4xf32, #tpu.memory_space<vmem>>, vector<1x1x4x4xf32>
    %186 = vector.shape_cast %185 : vector<1x1x4x4xf32> to vector<4x4xf32>
    %cst_133 = arith.constant dense<0.000000e+00> : vector<4x288xf32>
    %187 = tpu.matmul %186, %184, %cst_133 {dimension_numbers = #tpu.dot_dimension_numbers<[1], [0], [0], [1], [0, 0, 1, 1], [], []>} : vector<4x4xf32>, vector<4x288xf32>, vector<4x288xf32> -> vector<4x288xf32>
    %188 = arith.addf %183, %187 : vector<4x288xf32>
    %c0_134 = arith.constant 0 : index
    %c20_135 = arith.constant 20 : index
    %189 = vector.load %arg6[%c0_134, %c20_135] : memref<4x326xf32, #tpu.memory_space<vmem>>, vector<4x288xf32>
    %c1_136 = arith.constant 1 : index
    %c5_137 = arith.constant 5 : index
    %c0_138 = arith.constant 0 : index
    %c0_139 = arith.constant 0 : index
    %190 = vector.load %arg2[%c1_136, %c5_137, %c0_138, %c0_139] : memref<3x9x4x4xf32, #tpu.memory_space<vmem>>, vector<1x1x4x4xf32>
    %191 = vector.shape_cast %190 : vector<1x1x4x4xf32> to vector<4x4xf32>
    %cst_140 = arith.constant dense<0.000000e+00> : vector<4x288xf32>
    %192 = tpu.matmul %191, %189, %cst_140 {dimension_numbers = #tpu.dot_dimension_numbers<[1], [0], [0], [1], [0, 0, 1, 1], [], []>} : vector<4x4xf32>, vector<4x288xf32>, vector<4x288xf32> -> vector<4x288xf32>
    %193 = arith.addf %188, %192 : vector<4x288xf32>
    %c0_141 = arith.constant 0 : index
    %c36_142 = arith.constant 36 : index
    %194 = vector.load %arg6[%c0_141, %c36_142] : memref<4x326xf32, #tpu.memory_space<vmem>>, vector<4x288xf32>
    %c1_143 = arith.constant 1 : index
    %c6_144 = arith.constant 6 : index
    %c0_145 = arith.constant 0 : index
    %c0_146 = arith.constant 0 : index
    %195 = vector.load %arg2[%c1_143, %c6_144, %c0_145, %c0_146] : memref<3x9x4x4xf32, #tpu.memory_space<vmem>>, vector<1x1x4x4xf32>
    %196 = vector.shape_cast %195 : vector<1x1x4x4xf32> to vector<4x4xf32>
    %cst_147 = arith.constant dense<0.000000e+00> : vector<4x288xf32>
    %197 = tpu.matmul %196, %194, %cst_147 {dimension_numbers = #tpu.dot_dimension_numbers<[1], [0], [0], [1], [0, 0, 1, 1], [], []>} : vector<4x4xf32>, vector<4x288xf32>, vector<4x288xf32> -> vector<4x288xf32>
    %198 = arith.addf %193, %197 : vector<4x288xf32>
    %c0_148 = arith.constant 0 : index
    %c37_149 = arith.constant 37 : index
    %199 = vector.load %arg6[%c0_148, %c37_149] : memref<4x326xf32, #tpu.memory_space<vmem>>, vector<4x288xf32>
    %c1_150 = arith.constant 1 : index
    %c7_151 = arith.constant 7 : index
    %c0_152 = arith.constant 0 : index
    %c0_153 = arith.constant 0 : index
    %200 = vector.load %arg2[%c1_150, %c7_151, %c0_152, %c0_153] : memref<3x9x4x4xf32, #tpu.memory_space<vmem>>, vector<1x1x4x4xf32>
    %201 = vector.shape_cast %200 : vector<1x1x4x4xf32> to vector<4x4xf32>
    %cst_154 = arith.constant dense<0.000000e+00> : vector<4x288xf32>
    %202 = tpu.matmul %201, %199, %cst_154 {dimension_numbers = #tpu.dot_dimension_numbers<[1], [0], [0], [1], [0, 0, 1, 1], [], []>} : vector<4x4xf32>, vector<4x288xf32>, vector<4x288xf32> -> vector<4x288xf32>
    %203 = arith.addf %198, %202 : vector<4x288xf32>
    %c0_155 = arith.constant 0 : index
    %c38_156 = arith.constant 38 : index
    %204 = vector.load %arg6[%c0_155, %c38_156] : memref<4x326xf32, #tpu.memory_space<vmem>>, vector<4x288xf32>
    %c1_157 = arith.constant 1 : index
    %c8_158 = arith.constant 8 : index
    %c0_159 = arith.constant 0 : index
    %c0_160 = arith.constant 0 : index
    %205 = vector.load %arg2[%c1_157, %c8_158, %c0_159, %c0_160] : memref<3x9x4x4xf32, #tpu.memory_space<vmem>>, vector<1x1x4x4xf32>
    %206 = vector.shape_cast %205 : vector<1x1x4x4xf32> to vector<4x4xf32>
    %cst_161 = arith.constant dense<0.000000e+00> : vector<4x288xf32>
    %207 = tpu.matmul %206, %204, %cst_161 {dimension_numbers = #tpu.dot_dimension_numbers<[1], [0], [0], [1], [0, 0, 1, 1], [], []>} : vector<4x4xf32>, vector<4x288xf32>, vector<4x288xf32> -> vector<4x288xf32>
    %208 = arith.addf %203, %207 : vector<4x288xf32>
    %cst_162 = arith.constant 0.000000e+00 : f32
    %209 = vector.broadcast %cst_162 : f32 to vector<4x288xf32>
    %210 = arith.select %74, %208, %209 : vector<4x288xi1>, vector<4x288xf32>
    %211 = vector.shape_cast %210 : vector<4x288xf32> to vector<1x4x288xf32>
    %cst_163 = arith.constant dense<0.000000e+00> : vector<1xf32>
    %212 = vector.multi_reduction <add>, %211, %cst_163 [1, 2] : vector<1x4x288xf32> to vector<1xf32>
    %213 = vector.shape_cast %212 : vector<1xf32> to vector<1x1x1xf32>
    %214 = vector.extract %213[0, 0, 0] : f32 from vector<1x1x1xf32>
    %215 = vector.broadcast %214 : f32 to vector<1x1xf32>
    %216 = arith.mulf %210, %210 : vector<4x288xf32>
    %217 = vector.shape_cast %216 : vector<4x288xf32> to vector<1x4x288xf32>
    %cst_164 = arith.constant dense<0.000000e+00> : vector<1xf32>
    %218 = vector.multi_reduction <add>, %217, %cst_164 [1, 2] : vector<1x4x288xf32> to vector<1xf32>
    %219 = vector.shape_cast %218 : vector<1xf32> to vector<1x1x1xf32>
    %220 = vector.extract %219[0, 0, 0] : f32 from vector<1x1x1xf32>
    %221 = vector.broadcast %220 : f32 to vector<1x1xf32>
    %cst_165 = arith.constant 9.765625E-4 : f32
    %222 = vector.broadcast %cst_165 : f32 to vector<1x1xf32>
    %223 = arith.mulf %215, %222 : vector<1x1xf32>
    %cst_166 = arith.constant 9.765625E-4 : f32
    %224 = vector.broadcast %cst_166 : f32 to vector<1x1xf32>
    %225 = arith.mulf %221, %224 : vector<1x1xf32>
    %226 = arith.mulf %223, %223 : vector<1x1xf32>
    %227 = arith.subf %225, %226 : vector<1x1xf32>
    %cst_167 = arith.constant 9.99999974E-6 : f32
    %228 = vector.broadcast %cst_167 : f32 to vector<1x1xf32>
    %229 = arith.addf %227, %228 : vector<1x1xf32>
    %230 = math.rsqrt %229 : vector<1x1xf32>
    %231 = vector.broadcast %230 : vector<1x1xf32> to vector<4x1xf32>
    %232 = arith.mulf %75, %231 : vector<4x1xf32>
    %233 = vector.broadcast %223 : vector<1x1xf32> to vector<4x1xf32>
    %234 = arith.mulf %233, %232 : vector<4x1xf32>
    %235 = arith.subf %76, %234 : vector<4x1xf32>
    %236 = vector.broadcast %232 : vector<4x1xf32> to vector<4x288xf32>
    %237 = arith.mulf %210, %236 : vector<4x288xf32>
    %238 = vector.broadcast %235 : vector<4x1xf32> to vector<4x288xf32>
    %239 = arith.addf %237, %238 : vector<4x288xf32>
    %cst_168 = arith.constant 0.000000e+00 : f32
    %240 = vector.broadcast %cst_168 : f32 to vector<4x288xf32>
    %241 = arith.cmpf oge, %239, %240 : vector<4x288xf32>
    %242 = vector.broadcast %77 : vector<4x1xf32> to vector<4x288xf32>
    %243 = arith.mulf %242, %239 : vector<4x288xf32>
    %244 = arith.select %241, %239, %243 : vector<4x288xi1>, vector<4x288xf32>
    %cst_169 = arith.constant 0.000000e+00 : f32
    %245 = vector.broadcast %cst_169 : f32 to vector<4x288xf32>
    %246 = arith.select %74, %244, %245 : vector<4x288xi1>, vector<4x288xf32>
    %c0_170 = arith.constant 0 : index
    %c19_171 = arith.constant 19 : index
    %247 = vector.load %arg7[%c0_170, %c19_171] : memref<4x326xf32, #tpu.memory_space<vmem>>, vector<4x288xf32>
    tpu.vector_store %arg7[%c0_170, %c19_171], %246 {strides = array<i32>} : memref<4x326xf32, #tpu.memory_space<vmem>>, vector<4x288xf32>,
    %c0_172 = arith.constant 0 : index
    %c19_173 = arith.constant 19 : index
    %248 = vector.load %arg5[%c0_172, %c19_173] : memref<4x326xf32, #tpu.memory_space<vmem>>, vector<4x288xf32>
    %cst_174 = arith.constant 0.000000e+00 : f32
    %249 = vector.broadcast %cst_174 : f32 to vector<4x288xf32>
    %c0_175 = arith.constant 0 : index
    %c0_176 = arith.constant 0 : index
    %250 = vector.load %arg7[%c0_175, %c0_176] : memref<4x326xf32, #tpu.memory_space<vmem>>, vector<4x288xf32>
    %c2_177 = arith.constant 2 : index
    %c0_178 = arith.constant 0 : index
    %c0_179 = arith.constant 0 : index
    %c0_180 = arith.constant 0 : index
    %251 = vector.load %arg2[%c2_177, %c0_178, %c0_179, %c0_180] : memref<3x9x4x4xf32, #tpu.memory_space<vmem>>, vector<1x1x4x4xf32>
    %252 = vector.shape_cast %251 : vector<1x1x4x4xf32> to vector<4x4xf32>
    %cst_181 = arith.constant dense<0.000000e+00> : vector<4x288xf32>
    %253 = tpu.matmul %252, %250, %cst_181 {dimension_numbers = #tpu.dot_dimension_numbers<[1], [0], [0], [1], [0, 0, 1, 1], [], []>} : vector<4x4xf32>, vector<4x288xf32>, vector<4x288xf32> -> vector<4x288xf32>
    %254 = arith.addf %249, %253 : vector<4x288xf32>
    %c0_182 = arith.constant 0 : index
    %c1_183 = arith.constant 1 : index
    %255 = vector.load %arg7[%c0_182, %c1_183] : memref<4x326xf32, #tpu.memory_space<vmem>>, vector<4x288xf32>
    %c2_184 = arith.constant 2 : index
    %c1_185 = arith.constant 1 : index
    %c0_186 = arith.constant 0 : index
    %c0_187 = arith.constant 0 : index
    %256 = vector.load %arg2[%c2_184, %c1_185, %c0_186, %c0_187] : memref<3x9x4x4xf32, #tpu.memory_space<vmem>>, vector<1x1x4x4xf32>
    %257 = vector.shape_cast %256 : vector<1x1x4x4xf32> to vector<4x4xf32>
    %cst_188 = arith.constant dense<0.000000e+00> : vector<4x288xf32>
    %258 = tpu.matmul %257, %255, %cst_188 {dimension_numbers = #tpu.dot_dimension_numbers<[1], [0], [0], [1], [0, 0, 1, 1], [], []>} : vector<4x4xf32>, vector<4x288xf32>, vector<4x288xf32> -> vector<4x288xf32>
    %259 = arith.addf %254, %258 : vector<4x288xf32>
    %c0_189 = arith.constant 0 : index
    %c2_190 = arith.constant 2 : index
    %260 = vector.load %arg7[%c0_189, %c2_190] : memref<4x326xf32, #tpu.memory_space<vmem>>, vector<4x288xf32>
    %c2_191 = arith.constant 2 : index
    %c2_192 = arith.constant 2 : index
    %c0_193 = arith.constant 0 : index
    %c0_194 = arith.constant 0 : index
    %261 = vector.load %arg2[%c2_191, %c2_192, %c0_193, %c0_194] : memref<3x9x4x4xf32, #tpu.memory_space<vmem>>, vector<1x1x4x4xf32>
    %262 = vector.shape_cast %261 : vector<1x1x4x4xf32> to vector<4x4xf32>
    %cst_195 = arith.constant dense<0.000000e+00> : vector<4x288xf32>
    %263 = tpu.matmul %262, %260, %cst_195 {dimension_numbers = #tpu.dot_dimension_numbers<[1], [0], [0], [1], [0, 0, 1, 1], [], []>} : vector<4x4xf32>, vector<4x288xf32>, vector<4x288xf32> -> vector<4x288xf32>
    %264 = arith.addf %259, %263 : vector<4x288xf32>
    %c0_196 = arith.constant 0 : index
    %c18_197 = arith.constant 18 : index
    %265 = vector.load %arg7[%c0_196, %c18_197] : memref<4x326xf32, #tpu.memory_space<vmem>>, vector<4x288xf32>
    %c2_198 = arith.constant 2 : index
    %c3_199 = arith.constant 3 : index
    %c0_200 = arith.constant 0 : index
    %c0_201 = arith.constant 0 : index
    %266 = vector.load %arg2[%c2_198, %c3_199, %c0_200, %c0_201] : memref<3x9x4x4xf32, #tpu.memory_space<vmem>>, vector<1x1x4x4xf32>
    %267 = vector.shape_cast %266 : vector<1x1x4x4xf32> to vector<4x4xf32>
    %cst_202 = arith.constant dense<0.000000e+00> : vector<4x288xf32>
    %268 = tpu.matmul %267, %265, %cst_202 {dimension_numbers = #tpu.dot_dimension_numbers<[1], [0], [0], [1], [0, 0, 1, 1], [], []>} : vector<4x4xf32>, vector<4x288xf32>, vector<4x288xf32> -> vector<4x288xf32>
    %269 = arith.addf %264, %268 : vector<4x288xf32>
    %c0_203 = arith.constant 0 : index
    %c19_204 = arith.constant 19 : index
    %270 = vector.load %arg7[%c0_203, %c19_204] : memref<4x326xf32, #tpu.memory_space<vmem>>, vector<4x288xf32>
    %c2_205 = arith.constant 2 : index
    %c4_206 = arith.constant 4 : index
    %c0_207 = arith.constant 0 : index
    %c0_208 = arith.constant 0 : index
    %271 = vector.load %arg2[%c2_205, %c4_206, %c0_207, %c0_208] : memref<3x9x4x4xf32, #tpu.memory_space<vmem>>, vector<1x1x4x4xf32>
    %272 = vector.shape_cast %271 : vector<1x1x4x4xf32> to vector<4x4xf32>
    %cst_209 = arith.constant dense<0.000000e+00> : vector<4x288xf32>
    %273 = tpu.matmul %272, %270, %cst_209 {dimension_numbers = #tpu.dot_dimension_numbers<[1], [0], [0], [1], [0, 0, 1, 1], [], []>} : vector<4x4xf32>, vector<4x288xf32>, vector<4x288xf32> -> vector<4x288xf32>
    %274 = arith.addf %269, %273 : vector<4x288xf32>
    %c0_210 = arith.constant 0 : index
    %c20_211 = arith.constant 20 : index
    %275 = vector.load %arg7[%c0_210, %c20_211] : memref<4x326xf32, #tpu.memory_space<vmem>>, vector<4x288xf32>
    %c2_212 = arith.constant 2 : index
    %c5_213 = arith.constant 5 : index
    %c0_214 = arith.constant 0 : index
    %c0_215 = arith.constant 0 : index
    %276 = vector.load %arg2[%c2_212, %c5_213, %c0_214, %c0_215] : memref<3x9x4x4xf32, #tpu.memory_space<vmem>>, vector<1x1x4x4xf32>
    %277 = vector.shape_cast %276 : vector<1x1x4x4xf32> to vector<4x4xf32>
    %cst_216 = arith.constant dense<0.000000e+00> : vector<4x288xf32>
    %278 = tpu.matmul %277, %275, %cst_216 {dimension_numbers = #tpu.dot_dimension_numbers<[1], [0], [0], [1], [0, 0, 1, 1], [], []>} : vector<4x4xf32>, vector<4x288xf32>, vector<4x288xf32> -> vector<4x288xf32>
    %279 = arith.addf %274, %278 : vector<4x288xf32>
    %c0_217 = arith.constant 0 : index
    %c36_218 = arith.constant 36 : index
    %280 = vector.load %arg7[%c0_217, %c36_218] : memref<4x326xf32, #tpu.memory_space<vmem>>, vector<4x288xf32>
    %c2_219 = arith.constant 2 : index
    %c6_220 = arith.constant 6 : index
    %c0_221 = arith.constant 0 : index
    %c0_222 = arith.constant 0 : index
    %281 = vector.load %arg2[%c2_219, %c6_220, %c0_221, %c0_222] : memref<3x9x4x4xf32, #tpu.memory_space<vmem>>, vector<1x1x4x4xf32>
    %282 = vector.shape_cast %281 : vector<1x1x4x4xf32> to vector<4x4xf32>
    %cst_223 = arith.constant dense<0.000000e+00> : vector<4x288xf32>
    %283 = tpu.matmul %282, %280, %cst_223 {dimension_numbers = #tpu.dot_dimension_numbers<[1], [0], [0], [1], [0, 0, 1, 1], [], []>} : vector<4x4xf32>, vector<4x288xf32>, vector<4x288xf32> -> vector<4x288xf32>
    %284 = arith.addf %279, %283 : vector<4x288xf32>
    %c0_224 = arith.constant 0 : index
    %c37_225 = arith.constant 37 : index
    %285 = vector.load %arg7[%c0_224, %c37_225] : memref<4x326xf32, #tpu.memory_space<vmem>>, vector<4x288xf32>
    %c2_226 = arith.constant 2 : index
    %c7_227 = arith.constant 7 : index
    %c0_228 = arith.constant 0 : index
    %c0_229 = arith.constant 0 : index
    %286 = vector.load %arg2[%c2_226, %c7_227, %c0_228, %c0_229] : memref<3x9x4x4xf32, #tpu.memory_space<vmem>>, vector<1x1x4x4xf32>
    %287 = vector.shape_cast %286 : vector<1x1x4x4xf32> to vector<4x4xf32>
    %cst_230 = arith.constant dense<0.000000e+00> : vector<4x288xf32>
    %288 = tpu.matmul %287, %285, %cst_230 {dimension_numbers = #tpu.dot_dimension_numbers<[1], [0], [0], [1], [0, 0, 1, 1], [], []>} : vector<4x4xf32>, vector<4x288xf32>, vector<4x288xf32> -> vector<4x288xf32>
    %289 = arith.addf %284, %288 : vector<4x288xf32>
    %c0_231 = arith.constant 0 : index
    %c38_232 = arith.constant 38 : index
    %290 = vector.load %arg7[%c0_231, %c38_232] : memref<4x326xf32, #tpu.memory_space<vmem>>, vector<4x288xf32>
    %c2_233 = arith.constant 2 : index
    %c8_234 = arith.constant 8 : index
    %c0_235 = arith.constant 0 : index
    %c0_236 = arith.constant 0 : index
    %291 = vector.load %arg2[%c2_233, %c8_234, %c0_235, %c0_236] : memref<3x9x4x4xf32, #tpu.memory_space<vmem>>, vector<1x1x4x4xf32>
    %292 = vector.shape_cast %291 : vector<1x1x4x4xf32> to vector<4x4xf32>
    %cst_237 = arith.constant dense<0.000000e+00> : vector<4x288xf32>
    %293 = tpu.matmul %292, %290, %cst_237 {dimension_numbers = #tpu.dot_dimension_numbers<[1], [0], [0], [1], [0, 0, 1, 1], [], []>} : vector<4x4xf32>, vector<4x288xf32>, vector<4x288xf32> -> vector<4x288xf32>
    %294 = arith.addf %289, %293 : vector<4x288xf32>
    %cst_238 = arith.constant 0.000000e+00 : f32
    %295 = vector.broadcast %cst_238 : f32 to vector<4x288xf32>
    %296 = arith.select %74, %294, %295 : vector<4x288xi1>, vector<4x288xf32>
    %297 = vector.shape_cast %296 : vector<4x288xf32> to vector<1x4x288xf32>
    %cst_239 = arith.constant dense<0.000000e+00> : vector<1xf32>
    %298 = vector.multi_reduction <add>, %297, %cst_239 [1, 2] : vector<1x4x288xf32> to vector<1xf32>
    %299 = vector.shape_cast %298 : vector<1xf32> to vector<1x1x1xf32>
    %300 = vector.extract %299[0, 0, 0] : f32 from vector<1x1x1xf32>
    %301 = vector.broadcast %300 : f32 to vector<1x1xf32>
    %302 = arith.mulf %296, %296 : vector<4x288xf32>
    %303 = vector.shape_cast %302 : vector<4x288xf32> to vector<1x4x288xf32>
    %cst_240 = arith.constant dense<0.000000e+00> : vector<1xf32>
    %304 = vector.multi_reduction <add>, %303, %cst_240 [1, 2] : vector<1x4x288xf32> to vector<1xf32>
    %305 = vector.shape_cast %304 : vector<1xf32> to vector<1x1x1xf32>
    %306 = vector.extract %305[0, 0, 0] : f32 from vector<1x1x1xf32>
    %307 = vector.broadcast %306 : f32 to vector<1x1xf32>
    %cst_241 = arith.constant 9.765625E-4 : f32
    %308 = vector.broadcast %cst_241 : f32 to vector<1x1xf32>
    %309 = arith.mulf %301, %308 : vector<1x1xf32>
    %cst_242 = arith.constant 9.765625E-4 : f32
    %310 = vector.broadcast %cst_242 : f32 to vector<1x1xf32>
    %311 = arith.mulf %307, %310 : vector<1x1xf32>
    %312 = arith.mulf %309, %309 : vector<1x1xf32>
    %313 = arith.subf %311, %312 : vector<1x1xf32>
    %cst_243 = arith.constant 9.99999974E-6 : f32
    %314 = vector.broadcast %cst_243 : f32 to vector<1x1xf32>
    %315 = arith.addf %313, %314 : vector<1x1xf32>
    %316 = math.rsqrt %315 : vector<1x1xf32>
    %317 = vector.broadcast %316 : vector<1x1xf32> to vector<4x1xf32>
    %318 = arith.mulf %75, %317 : vector<4x1xf32>
    %319 = vector.broadcast %309 : vector<1x1xf32> to vector<4x1xf32>
    %320 = arith.mulf %319, %318 : vector<4x1xf32>
    %321 = arith.subf %76, %320 : vector<4x1xf32>
    %322 = vector.broadcast %318 : vector<4x1xf32> to vector<4x288xf32>
    %323 = arith.mulf %296, %322 : vector<4x288xf32>
    %324 = vector.broadcast %321 : vector<4x1xf32> to vector<4x288xf32>
    %325 = arith.addf %323, %324 : vector<4x288xf32>
    %326 = arith.addf %325, %248 : vector<4x288xf32>
    %cst_244 = arith.constant 0.000000e+00 : f32
    %327 = vector.broadcast %cst_244 : f32 to vector<4x288xf32>
    %328 = arith.cmpf oge, %326, %327 : vector<4x288xf32>
    %329 = vector.broadcast %77 : vector<4x1xf32> to vector<4x288xf32>
    %330 = arith.mulf %329, %326 : vector<4x288xf32>
    %331 = arith.select %328, %326, %330 : vector<4x288xi1>, vector<4x288xf32>
    %c0_245 = arith.constant 0 : index
    %c0_246 = arith.constant 0 : index
    %c0_247 = arith.constant 0 : index
    %332 = vector.load %arg4[%c0_245, %c0_246, %c0_247] : memref<1x4x288xf32, #tpu.memory_space<vmem>>, vector<1x4x288xf32>
    %333 = vector.shape_cast %332 : vector<1x4x288xf32> to vector<4x288xf32>
    %334 = vector.shape_cast %331 : vector<4x288xf32> to vector<1x4x288xf32>
    tpu.vector_store %arg4[%c0_245, %c0_246, %c0_247], %334 {strides = array<i32>} : memref<1x4x288xf32, #tpu.memory_space<vmem>>, vector<1x4x288xf32>,
    return
  }
  func.func @transform_0(%arg0: i32) -> (i32, i32, i32, i32) {
    %c0_i32 = arith.constant 0 : i32
    %c0_i32_0 = arith.constant 0 : i32
    %c0_i32_1 = arith.constant 0 : i32
    %c0_i32_2 = arith.constant 0 : i32
    return %arg0, %c0_i32, %c0_i32_0, %c0_i32_1 : i32, i32, i32, i32
  }
  func.func @transform_1(%arg0: i32) -> (i32, i32, i32, i32) {
    %c0_i32 = arith.constant 0 : i32
    %c0_i32_0 = arith.constant 0 : i32
    %c0_i32_1 = arith.constant 0 : i32
    %c0_i32_2 = arith.constant 0 : i32
    %c0_i32_3 = arith.constant 0 : i32
    return %c0_i32, %c0_i32_0, %c0_i32_1, %c0_i32_2 : i32, i32, i32, i32
  }
  func.func @transform_2(%arg0: i32) -> (i32, i32) {
    %c0_i32 = arith.constant 0 : i32
    %c0_i32_0 = arith.constant 0 : i32
    %c0_i32_1 = arith.constant 0 : i32
    return %c0_i32, %c0_i32_0 : i32, i32
  }
  func.func @transform_3(%arg0: i32) -> (i32, i32, i32) {
    %c0_i32 = arith.constant 0 : i32
    %c0_i32_0 = arith.constant 0 : i32
    %c0_i32_1 = arith.constant 0 : i32
    return %arg0, %c0_i32, %c0_i32_0 : i32, i32, i32
  }
}

</mosaic_0001>

<bundles_post_ra>
// kernel: brb_forward.1
= control target key start
LH: loop header
LB: loop body
LE: loop exit
PB: predicated region body
PF: predicated region fallthrough
CT: control target
= control target key end

     0   :  { %s5830_s12 = smov 0   ;;  %s6716_s0 = inlined_call_operand.vmem [shape: f32[2,4,16,16], index: 0, kind: input, shape index: {}]   ;;  %s6717_s1 = inlined_call_operand.vmem [shape: f32[3,9,4,4], index: 1, kind: input, shape index: {}]   ;;  %s6718_s2 = inlined_call_operand.vmem [shape: f32[4,3], index: 2, kind: input, shape index: {}]   ;;  %s6719_s3 = inlined_call_operand.vmem [shape: f32[2,4,288], index: 3, kind: output, shape index: {}]  }
   0x1 LB: > { %s5334_s13 = sadd.s32 4294967295, %s5781_s12   ;;  %p5338_p0 = scmp.ge.s32.totalorder %s5781_s12, 1  ;;  %s5781_s12 = sphi %s5830_s12, %s13_s12  }
   0x2   : > { %p137_p1 = scmp.lt.s32.totalorder %s5781_s12, 3 }
   0x4   : > { %p138_p2 = pnand %p5338_p0, %p137_p1 }
   0x5   : > { %p161_p3 = scmp.lt.s32.totalorder (!%p138_p2), %s5334_s13, 1  ;;  %s5784_s18 = smov (!%p138_p2), 55  }
   0x6   : > { %141 = sbr.rel (%p138_p2) target bundleno = 2958 (0xb8e), region = 32  ;;  %s5785_s19 = smov (!%p138_p2), 19  }
   0x7   : > { %s5786_s20 = smov (!%p138_p2), 73   ;;  %s5787_s21 = smov (!%p138_p2), 37  }
   0x8   : > { %s5788_s22 = smov (!%p138_p2), 53   ;;  %s5789_s23 = smov (!%p138_p2), 35  }
   0x9   : > { %s5790_s24 = smov (!%p138_p2), 91   ;;  %s5791_s25 = smov (!%p138_p2), 127  }
   0xa   : > { %s5792_s26 = smov (!%p138_p2), 17   ;;  %s5793_s27 = smov (!%p138_p2), 109  }
   0xb   : > { %s6766_s13 = smov (!%p161_p3, %s5334_s13), 1  ;;  %v5783_v0 = vmov 0.0   ;;  %vm191_vm0 = vcmask 1041409   ;;  %vm193_vm1 = vcmask 1045509   ;;  %vm196_vm2 = vcmask 1042434   ;;  %s5794_s28 = smov 125  }
   0xc   : > { %171 = vst [vmem:[#allocation2] sm:$0xff] %v5783_v0  ;;  %174 = vst [vmem:[#allocation3] sm:$0xff] %v5783_v0  ;;  %5560 = vmatprep.subr.mxu1 %v5783_v0  ;;  %589 = vmatprep.mubr.f32.mxu0 %v5783_v0  ;;  %s5505_s14 = sshll.u32 %s6766_s13, 6  ;;  %vm198_vm3 = vcmask 1046534   ;;  %vm201_vm4 = vcmask 1043459   ;;  %vm203_vm5 = vcmask 1047559  }
   0xd   : > { %176 = vst [vmem:[#allocation4] sm:$0xff] %v5783_v0  ;;  %s5849_s17 = scalar_lea.vmem %s6716_s0, %s5505_s14  ;;  %s5795_s29 = smov 71   ;;  %vm172_vm6 = vcmask 568320   ;;  %vm208_vm7 = vcmask 281752   ;;  %vm222_vm8 = vcmask 429352   ;;  %vm236_vm9 = vcmask 576952  }
   0xe   : > { %v178_v1 = vld [vmem:[%s5849_s17] sm:$0xff]  ;;  %v180_v2 = vld [vmem:[%s5849_s17 + $0x10] sm:$0xff]  ;;  %v5874_v29 = vld [vmem:[%s5849_s17 + $0x8] sm:$0xff]  ;;  %s5796_s30 = smov 107   ;;  %s5797_s4 = smov 89   ;;  %vm250_vm10 = vcmask 724552  }
   0xf   : > { %v182_v3 = vld [vmem:[%s5849_s17 + $0x20] sm:$0xff]  ;;  %v5855_v4 = vld [vmem:[%s5849_s17 + $0x30] sm:$0xff]  ;;  %v224_v5 = vrot.slane %v178_v1, 2  ;;  %v225_v6 = vrot.slane %v180_v2, 1  ;;  %v190_v8 = vrot.slane %v180_v2, 7  ;;  %v238_v12 = vrot.slane %v178_v1, 3 }
  0x10   : > { %v5857_v7 = vcombine.high %v182_v3, %v182_v3  ;;  %v230_v9 = vrot.slane %v5855_v4, 7  ;;  %v195_v10 = vrot.slane %v182_v3, 6  ;;  %v200_v11 = vrot.slane %v5855_v4, 5  ;;  %v5877_v30 = vld [vmem:[%s5849_s17 + $0x28] sm:$0xff]  ;;  %v5884_v35 = vld [vmem:[%s5849_s17 + $0x18] sm:$0xff]  ;;  %s5798_s5 = smov 15  }
  0x11   : > { %v226_v13 = vsel %vm191_vm0, %v225_v6, %v224_v5  ;;  %v192_v14 = vsel %vm191_vm0, %v190_v8, %v178_v1  ;;  %v239_v15 = vrot.slane %v180_v2, 2  ;;  %v242_v16 = vrot.slane %v182_v3, 1  ;;  %v5887_v36 = vld [vmem:[%s5849_s17 + $0x38] sm:$0xff]  ;;  %173 = vst.msk [vmem:[#allocation2 + $0x8] sm:$0xf] %vm172_vm6, %v5783_v0  ;;  %s5799_s6 = smov 33  }
  0x12   : > { %v227_v17 = vsel %vm193_vm1, %v225_v6, %v226_v13  ;;  %v194_v18 = vsel %vm193_vm1, %v190_v8, %v192_v14  ;;  %v210_v19 = vrot.slane %v178_v1, 1  ;;  %v213_v20 = vrot.slane %v182_v3, 7  ;;  %175 = vst.msk [vmem:[#allocation3 + $0x8] sm:$0xf] %vm172_vm6, %v5783_v0  ;;  %177 = vst.msk [vmem:[#allocation4 + $0x8] sm:$0xf] %vm172_vm6, %v5783_v0 }
  0x13   : > { %v228_v21 = vsel %vm196_vm2, %v182_v3, %v227_v17  ;;  %v197_v22 = vsel %vm196_vm2, %v195_v10, %v194_v18  ;;  %v240_v23 = vsel %vm191_vm0, %v239_v15, %v238_v12  ;;  %v216_v24 = vrot.slane %v5855_v4, 6  ;;  %s5801_s7 = smov 126   ;;  %s5802_s8 = smov 110  }
  0x14   : > { %v229_v25 = vsel %vm198_vm3, %v182_v3, %v228_v21  ;;  %v199_v26 = vsel %vm198_vm3, %v195_v10, %v197_v22  ;;  %v241_v27 = vsel %vm193_vm1, %v239_v15, %v240_v23  ;;  %v211_v28 = vsel %vm191_vm0, %v180_v2, %v210_v19  ;;  %s5803_s9 = smov 108   ;;  %s5804_s10 = smov 92  }
  0x15   : > { %v231_v31 = vsel %vm201_vm4, %v230_v9, %v229_v25  ;;  %v202_v32 = vsel %vm201_vm4, %v200_v11, %v199_v26  ;;  %v243_v33 = vsel %vm196_vm2, %v242_v16, %v241_v27  ;;  %v212_v34 = vsel %vm193_vm1, %v180_v2, %v211_v28  ;;  %s5805_s11 = smov 90  }
  0x16   : > { %v232_v37 = vsel %vm203_vm5, %v230_v9, %v231_v31  ;;  %v204_v38 = vsel %vm203_vm5, %v200_v11, %v202_v32  ;;  %v244_v39 = vsel %vm198_vm3, %v242_v16, %v243_v33  ;;  %v214_v40 = vsel %vm196_vm2, %v213_v20, %v212_v34 }
  0x17   : > { %233 = vrot.lane.b32.xlu1 %v232_v37, %s5784_s18  ;;  %205 = vrot.lane.b32.xlu0 %v204_v38, %s5785_s19  ;;  %v245_v41 = vsel %vm201_vm4, %v5855_v4, %v244_v39  ;;  %v215_v42 = vsel %vm198_vm3, %v213_v20, %v214_v40  ;;  %v335_v43 = vrot.slane %v5874_v29, 1  ;;  %v338_v44 = vrot.slane %v5877_v30, 7 }
  0x18   : > { %v246_v45 = vsel %vm203_vm5, %v5855_v4, %v245_v41  ;;  %v217_v46 = vsel %vm201_vm4, %v216_v24, %v215_v42  ;;  %v341_v47 = vrot.slane %v5887_v36, 6  ;;  %v321_v48 = vrot.slane %v5884_v35, 7 }
  0x19   : > { %v218_v49 = vsel %vm203_vm5, %v216_v24, %v217_v46  ;;  %v336_v50 = vsel %vm191_vm0, %v5884_v35, %v335_v43  ;;  %v324_v51 = vrot.slane %v5877_v30, 6  ;;  %v327_v52 = vrot.slane %v5887_v36, 5 }
  0x1a   : > { %v337_v53 = vsel %vm193_vm1, %v5884_v35, %v336_v50  ;;  %v322_v54 = vsel %vm191_vm0, %v321_v48, %v5874_v29  ;;  %v252_v55 = vcombine.high %v178_v1, %v178_v1  ;;  %v253_v56 = vcombine.high %v180_v2, %v180_v2 }
  0x1b   : > { %247 = vrot.lane.b32.xlu1 %v246_v45, %s5786_s20  ;;  %219 = vrot.lane.b32.xlu0 %v218_v49, %s5787_s21  ;;  %v339_v57 = vsel %vm196_vm2, %v338_v44, %v337_v53  ;;  %v323_v58 = vsel %vm193_vm1, %v321_v48, %v322_v54  ;;  %v255_v59 = vcombine.high %v5855_v4, %v5855_v4  ;;  %v259_v60 = vrot.slane %v5857_v7, 6  ;;  %s5808_s21 = smov 1  }
  0x1c   : > { %v340_v61 = vsel %vm198_vm3, %v338_v44, %v339_v57  ;;  %v325_v62 = vsel %vm196_vm2, %v324_v51, %v323_v58  ;;  %v256_v63 = vrot.slane %v253_v56, 7  ;;  %v284_v1 = vrot.slane %v252_v55, 2 }
  0x1d   : > { %v342_v2 = vsel %vm201_vm4, %v341_v47, %v340_v61  ;;  %v326_v3 = vsel %vm198_vm3, %v324_v51, %v325_v62  ;;  %v262_v5 = vrot.slane %v255_v59, 5  ;;  %v285_v6 = vrot.slane %v253_v56, 1 }
  0x1e   : > { %v343_v8 = vsel %vm203_vm5, %v341_v47, %v342_v2  ;;  %v328_v9 = vsel %vm201_vm4, %v327_v52, %v326_v3  ;;  %v257_v4 = vsel %vm191_vm0, %v256_v63, %v252_v55  ;;  %v290_v10 = vrot.slane %v255_v59, 7 }
  0x1f   : > { %344 = vrot.lane.b32.xlu1 %v343_v8, %s5788_s22  ;;  %v329_v11 = vsel %vm203_vm5, %v327_v52, %v328_v9  ;;  %v258_v12 = vsel %vm193_vm1, %v256_v63, %v257_v4  ;;  %v286_v13 = vsel %vm191_vm0, %v285_v6, %v284_v1  ;;  %v303_v14 = vrot.slane %v252_v55, 3 }
  0x20   : > { %330 = vrot.lane.b32.xlu0 %v329_v11, %s5789_s23  ;;  %v260_v15 = vsel %vm196_vm2, %v259_v60, %v258_v12  ;;  %v287_v16 = vsel %vm193_vm1, %v285_v6, %v286_v13  ;;  %v304_v17 = vrot.slane %v253_v56, 2  ;;  %v307_v18 = vrot.slane %v5857_v7, 1 }
  0x21   : > { %v261_v19 = vsel %vm198_vm3, %v259_v60, %v260_v15  ;;  %v288_v20 = vsel %vm196_vm2, %v5857_v7, %v287_v16  ;;  %v270_v21 = vrot.slane %v252_v55, 1  ;;  %v273_v22 = vrot.slane %v5857_v7, 7 }
  0x22   : > { %v263_v23 = vsel %vm201_vm4, %v262_v5, %v261_v19  ;;  %v289_v24 = vsel %vm198_vm3, %v5857_v7, %v288_v20  ;;  %v305_v25 = vsel %vm191_vm0, %v304_v17, %v303_v14  ;;  %v276_v26 = vrot.slane %v255_v59, 6 }
  0x23   : > { %v264_v27 = vsel %vm203_vm5, %v262_v5, %v263_v23  ;;  %v291_v28 = vsel %vm201_vm4, %v290_v10, %v289_v24  ;;  %v306_v31 = vsel %vm193_vm1, %v304_v17, %v305_v25  ;;  %v271_v32 = vsel %vm191_vm0, %v253_v56, %v270_v21 }
  0x24   : > { %265 = vrot.lane.b32.xlu1 %v264_v27, %s5790_s24  ;;  %v292_v33 = vsel %vm203_vm5, %v290_v10, %v291_v28  ;;  %v308_v34 = vsel %vm196_vm2, %v307_v18, %v306_v31  ;;  %v272_v7 = vsel %vm193_vm1, %v253_v56, %v271_v32  ;;  %v5949_v37 = vcombine.high %v5874_v29, %v5874_v29 }
  0x25   : > { %293 = vrot.lane.b32.xlu0 %v292_v33, %s5791_s25  ;;  %v309_v38 = vsel %vm198_vm3, %v307_v18, %v308_v34  ;;  %v274_v39 = vsel %vm196_vm2, %v273_v22, %v272_v7  ;;  %v5956_v40 = vcombine.high %v5884_v35, %v5884_v35  ;;  %v5960_v41 = vcombine.high %v5877_v30, %v5877_v30 }
  0x26   : > { %v310_v42 = vsel %vm201_vm4, %v255_v59, %v309_v38  ;;  %v275_v43 = vsel %vm198_vm3, %v273_v22, %v274_v39  ;;  %v5966_v44 = vcombine.high %v5887_v36, %v5887_v36  ;;  %v395_v45 = vrot.slane %v5949_v37, 1 }
  0x27   : > { %v311_v46 = vsel %vm203_vm5, %v255_v59, %v310_v42  ;;  %v277_v47 = vsel %vm201_vm4, %v276_v26, %v275_v43  ;;  %v398_v48 = vrot.slane %v5960_v41, 7  ;;  %v349_v49 = vrot.slane %v5874_v29, 2 }
  0x28   : > { %312 = vrot.lane.b32.xlu1 %v311_v46, %s5792_s26  ;;  %v278_v50 = vsel %vm203_vm5, %v276_v26, %v277_v47  ;;  %v396_v51 = vsel %vm191_vm0, %v5956_v40, %v395_v45  ;;  %v401_v52 = vrot.slane %v5966_v44, 6  ;;  %v350_v53 = vrot.slane %v5884_v35, 1 }
  0x29   : > { %279 = vrot.lane.b32.xlu0 %v278_v50, %s5793_s27  ;;  %v397_v54 = vsel %vm193_vm1, %v5956_v40, %v396_v51  ;;  %v355_v55 = vrot.slane %v5887_v36, 7  ;;  %v363_v56 = vrot.slane %v5874_v29, 3  ;;  %v364_v57 = vrot.slane %v5884_v35, 2 }
  0x2a   : > { %v399_v58 = vsel %vm196_vm2, %v398_v48, %v397_v54  ;;  %v351_v59 = vsel %vm191_vm0, %v350_v53, %v349_v49  ;;  %v367_v60 = vrot.slane %v5877_v30, 1  ;;  %v381_v61 = vrot.slane %v5956_v40, 7 }
  0x2b   : > { %v400_v62 = vsel %vm198_vm3, %v398_v48, %v399_v58  ;;  %v352_v63 = vsel %vm193_vm1, %v350_v53, %v351_v59  ;;  %v365_v1 = vsel %vm191_vm0, %v364_v57, %v363_v56  ;;  %v384_v2 = vrot.slane %v5960_v41, 6 }
  0x2c   : > { %v402_v29 = vsel %vm201_vm4, %v401_v52, %v400_v62  ;;  %v353_v35 = vsel %vm196_vm2, %v5877_v30, %v352_v63  ;;  %v366_v3 = vsel %vm193_vm1, %v364_v57, %v365_v1  ;;  %v382_v5 = vsel %vm191_vm0, %v381_v61, %v5949_v37 }
  0x2d   : > { %v403_v6 = vsel %vm203_vm5, %v401_v52, %v402_v29  ;;  %v354_v8 = vsel %vm198_vm3, %v5877_v30, %v353_v35  ;;  %v368_v9 = vsel %vm196_vm2, %v367_v60, %v366_v3  ;;  %v383_v4 = vsel %vm193_vm1, %v381_v61, %v382_v5 }
  0x2e   : > { %404 = vrot.lane.b32.xlu1 %v403_v6, %s5794_s28  ;;  %v356_v10 = vsel %vm201_vm4, %v355_v55, %v354_v8  ;;  %v369_v11 = vsel %vm198_vm3, %v367_v60, %v368_v9  ;;  %v385_v12 = vsel %vm196_vm2, %v384_v2, %v383_v4  ;;  %v387_v13 = vrot.slane %v5966_v44, 5  ;;  %v5342_v4 = vld [vmem:[%s6717_s1 + $0x4] sm:$0xf] }
  0x2f   : > { %v357_v14 = vsel %vm203_vm5, %v355_v55, %v356_v10  ;;  %v370_v15 = vsel %vm201_vm4, %v5887_v36, %v369_v11  ;;  %v386_v30 = vsel %vm198_vm3, %v384_v2, %v385_v12  ;;  %v414_v16 = vrot.slane %v5949_v37, 2  ;;  %v500_v12 = vld [vmem:[%s6717_s1] sm:$0xf] }
  0x30   : > { %358 = vrot.lane.b32.xlu0 %v357_v14, %s5795_s29  ;;  %v371_v17 = vsel %vm203_vm5, %v5887_v36, %v370_v15  ;;  %v388_v18 = vsel %vm201_vm4, %v387_v13, %v386_v30  ;;  %v415_v19 = vrot.slane %v5956_v40, 1  ;;  %v428_v21 = vrot.slane %v5949_v37, 3 }
  0x31   : > { %v389_v20 = vsel %vm203_vm5, %v387_v13, %v388_v18  ;;  %v429_v22 = vrot.slane %v5956_v40, 2  ;;  %v432_v23 = vrot.slane %v5960_v41, 1  ;;  %v420_v25 = vrot.slane %v5966_v44, 7  ;;  %v5353_v18 = vld [vmem:[%s6717_s1 + $0x8] sm:$0xf] }
  0x32   : > { %390 = vrot.lane.b32.xlu1 %v389_v20, %s5796_s30  ;;  %v416_v24 = vsel %vm191_vm0, %v415_v19, %v414_v16  ;;  %vm268_vm11 = vcmask 872152   ;;  %vm299_vm12 = vcmask 1044472   ;;  %vm300_vm13 = vcmask 121860  }
  0x33   : > { %v417_v36 = vsel %vm193_vm1, %v415_v19, %v416_v24  ;;  %v430_v26 = vsel %vm191_vm0, %v429_v22, %v428_v21  ;;  %vm296_vm14 = vcmask 1039360   ;;  %vm282_vm15 = vcmask 1019752   ;;  %vm301_vm0 = vmor %vm300_vm13, %vm299_vm12 }
  0x34   : > { %372 = vrot.lane.b32.xlu0 %v371_v17, %s5797_s4  ;;  %v418_v27 = vsel %vm196_vm2, %v5960_v41, %v417_v36  ;;  %v431_v28 = vsel %vm193_vm1, %v429_v22, %v430_v26  ;;  %vm315_vm1 = vcmask 265352   ;;  %vm411_vm6 = vcmask 105476  }
  0x35   : > { %v419_v31 = vsel %vm198_vm3, %v5960_v41, %v418_v27  ;;  %v433_v32 = vsel %vm196_vm2, %v432_v23, %v431_v28  ;;  %vm333_vm2 = vcmask 412952   ;;  %vm440_vm12 = vcmask 396552   ;;  %v5365_v27 = vld [vmem:[%s6717_s1 + $0x10] sm:$0xf] }
  0x36   : > { %v421_v33 = vsel %vm201_vm4, %v420_v25, %v419_v31  ;;  %v434_v34 = vsel %vm198_vm3, %v432_v23, %v433_v32  ;;  %vm347_vm3 = vcmask 560552   ;;  %vm5800_vm13 = vmmov 0   ;;  %v5359_v23 = vld [vmem:[%s6717_s1 + $0xc] sm:$0xf] }
  0x37   : > { %v422_v7 = vsel %vm203_vm5, %v420_v25, %v421_v33  ;;  %v435_v37 = vsel %vm201_vm4, %v5966_v44, %v434_v34  ;;  %vm361_vm4 = vcmask 708152   ;;  %5562 = vmatprep.mubr.msk.f32.mxu1 %vm5800_vm13, %v5783_v0  ;;  %v5371_v34 = vld [vmem:[%s6717_s1 + $0x14] sm:$0xf] }
  0x38   : > { %423 = vrot.lane.b32.xlu0 %v422_v7, %s5798_s5  ;;  %v436_v38 = vsel %vm203_vm5, %v5966_v44, %v435_v37  ;;  %vm410_vm5 = vcmask 1044456  }
  0x39   : > { %437 = vrot.lane.b32.xlu1 %v436_v38, %s5799_s6 }
  0x89   : > { %v234_v39 = vpop.permute.xlu1 %233  ;;  %v206_v40 = vpop.permute.xlu0 %205 }
  0x8a   : > { %209 = vst.msk [vmem:[#allocation2] sm:$0xf] %vm208_vm7, %v206_v40  ;;  %vm375_vm7 = vcmask 855752   ;;  %v5377_v40 = vld [vmem:[%s6717_s1 + $0x18] sm:$0xf] }
  0x8d   : > { %v248_v41 = vpop.permute.xlu1 %247  ;;  %v220_v42 = vpop.permute.xlu0 %219 }
  0x8e   : > { %223 = vst.msk [vmem:[#allocation2] sm:$0xf] %vm222_vm8, %v220_v42  ;;  %vm407_vm8 = vcmask 1022976  }
  0x8f   : > { %237 = vst.msk [vmem:[#allocation2] sm:$0xf] %vm236_vm9, %v234_v39  ;;  %vm393_vm9 = vcmask 1003352  }
  0x90   : > { %251 = vst.msk [vmem:[#allocation2] sm:$0xf] %vm250_vm10, %v248_v41  ;;  %vm412_vm10 = vmor %vm411_vm6, %vm410_vm5  ;;  %vm6722_vm5 = vcmask 752640   ;;  %vm6721_vm6 = vcmask 744448  }
  0x91   : > { %v345_v43 = vpop.permute.xlu1 %344 }
  0x92   : > { %v331_v44 = vpop.permute.xlu0 %330 }
  0x96   : > { %v266_v45 = vpop.permute.xlu1 %265 }
  0x97   : > { %269 = vst.msk [vmem:[#allocation2] sm:$0xf] %vm268_vm11, %v266_v45  ;;  %v294_v46 = vpop.permute.xlu0 %293  ;;  %vm426_vm11 = vcmask 248952   ;;  %v5383_v45 = vld [vmem:[%s6717_s1 + $0x1c] sm:$0xf] }
  0x98   : > { %v295_v47 = vrot.slane %v294_v46, 4 }
  0x9a   : > { %v313_v48 = vpop.permute.xlu1 %312  ;;  %v297_v50 = vsel %vm296_vm14, %v295_v47, %v294_v46 }
  0x9b   : > { %v280_v49 = vpop.permute.xlu0 %279 }
  0x9c   : > { %283 = vst.msk [vmem:[#allocation2] sm:$0xf] %vm282_vm15, %v280_v49  ;;  %vm518_vm15 = vcmask 1043456  }
  0x9d   : > { %302 = vst.msk [vmem:[#allocation2] sm:$0xff] %vm301_vm0, %v297_v50  ;;  %vm514_vm0 = vcmask 31744   ;;  %v5389_v50 = vld [vmem:[%s6717_s1 + $0x20] sm:$0xf] }
  0x9e   : > { %316 = vst.msk [vmem:[#allocation2 + $0x4] sm:$0xf] %vm315_vm1, %v313_v48  ;;  %vm829_vm1 = vcmask 1031168  }
  0x9f   : > { %334 = vst.msk [vmem:[#allocation2 + $0x4] sm:$0xf] %vm333_vm2, %v331_v44  ;;  %vm998_vm2 = vcmask 900096  }
  0xa0   : > { %v405_v51 = vpop.permute.xlu1 %404  ;;  %348 = vst.msk [vmem:[#allocation2 + $0x4] sm:$0xf] %vm347_vm3, %v345_v43  ;;  %vm6725_vm3 = vcmask 891904  }
  0xa1   : > { %v406_v53 = vrot.slane %v405_v51, 4 }
  0xa2   : > { %v359_v52 = vpop.permute.xlu0 %358 }
  0xa3   : > { %362 = vst.msk [vmem:[#allocation2 + $0x4] sm:$0xf] %vm361_vm4, %v359_v52  ;;  %v408_v56 = vsel %vm407_vm8, %v406_v53, %v405_v51  ;;  %vm6724_vm4 = vcmask 883712  }
  0xa4   : > { %v391_v54 = vpop.permute.xlu1 %390 }
  0xa6   : > { %v373_v55 = vpop.permute.xlu0 %372 }
  0xa7   : > { %376 = vst.msk [vmem:[#allocation2 + $0x4] sm:$0xf] %vm375_vm7, %v373_v55  ;;  %vm6720_vm7 = vcmask 736256   ;;  %v442_v55 = vlaneseq }
  0xa8   : > { %394 = vst.msk [vmem:[#allocation2 + $0x4] sm:$0xf] %vm393_vm9, %v391_v54 }
  0xa9   : > { %413 = vst.msk [vmem:[#allocation2 + $0x4] sm:$0xff] %vm412_vm10, %v408_v56 }
  0xaa   : > { %v424_v57 = vpop.permute.xlu0 %423 }
  0xab   : > { %427 = vst.msk [vmem:[#allocation2 + $0x8] sm:$0xf] %vm426_vm11, %v424_v57  ;;  %v438_v58 = vpop.permute.xlu1 %437  ;;  %v443_v57 = vand.u32 127, %v442_v55 }
  0xac   : > { %441 = vst.msk [vmem:[#allocation2 + $0x8] sm:$0xf] %vm440_vm12, %v438_v58 }
  0xb0   : > { %v6043_v59 = vld [vmem:[#allocation2] sm:$0xff] }
  0xb1   : > { %823 = vrot.lane.b32.xlu1 %v6043_v59, %s5801_s7  ;;  %506 = vrot.lane.b32.xlu0 %v6043_v59, %s5791_s25  ;;  %v822_v61 = vcombine.high %v6043_v59, %v6043_v59 }
  0xb3   : > { %v499_v60 = vld [vmem:[#allocation2 + $0x8] sm:$0xf] }
  0xb4   : > { %v817_v62 = vld [vmem:[#allocation2 + $0x8] sm:$0xf] }
  0xb5   : > { %1161 = vrot.lane.b32.xlu1 %v6043_v59, %s5793_s27  ;;  %992 = vrot.lane.b32.xlu0 %v6043_v59, %s5802_s8  ;;  %v986_v63 = vld [vmem:[#allocation2 + $0x8] sm:$0xf] }
  0xb6   : > { %v1155_v1 = vld [vmem:[#allocation2 + $0x8] sm:$0xf] }
  0xb7   : > { %v1324_v2 = vld [vmem:[#allocation2 + $0x8] sm:$0xf] }
  0xb8   : > { %v1493_v29 = vld [vmem:[#allocation2 + $0x8] sm:$0xf] }
  0xb9   : > { %1330 = vrot.lane.b32.xlu0 %v6043_v59, %s5803_s9  ;;  %510 = vrot.lane.b32.xlu1 %v499_v60, %s5791_s25  ;;  %v1662_v35 = vld [vmem:[#allocation2 + $0x8] sm:$0xf] }
  0xba   : > { %v1831_v3 = vld [vmem:[#allocation2 + $0x8] sm:$0xf] }
  0xbd   : > { %508 = vrot.lane.b32.xlu0 %v822_v61, %s5791_s25  ;;  %1499 = vrot.lane.b32.xlu1 %v6043_v59, %s5804_s10 }
  0xc1   : > { %1668 = vrot.lane.b32.xlu0 %v6043_v59, %s5790_s24  ;;  %825 = vrot.lane.b32.xlu1 %v822_v61, %s5801_s7 }
  0xc5   : > { %827 = vrot.lane.b32.xlu0 %v817_v62, %s5801_s7  ;;  %996 = vrot.lane.b32.xlu1 %v986_v63, %s5802_s8  ;;  %v444_v63 = vadd.s32 128, %v443_v57 }
  0xc9   : > { %994 = vrot.lane.b32.xlu0 %v822_v61, %s5802_s8  ;;  %1163 = vrot.lane.b32.xlu1 %v822_v61, %s5793_s27 }
  0xcd   : > { %1165 = vrot.lane.b32.xlu0 %v1155_v1, %s5793_s27  ;;  %1334 = vrot.lane.b32.xlu1 %v1324_v2, %s5803_s9 }
  0xd1   : > { %1332 = vrot.lane.b32.xlu0 %v822_v61, %s5803_s9  ;;  %1501 = vrot.lane.b32.xlu1 %v822_v61, %s5804_s10 }
  0xd5   : > { %1503 = vrot.lane.b32.xlu0 %v1493_v29, %s5804_s10  ;;  %1672 = vrot.lane.b32.xlu1 %v1662_v35, %s5790_s24 }
  0xd9   : > { %1670 = vrot.lane.b32.xlu0 %v822_v61, %s5790_s24  ;;  %1839 = vrot.lane.b32.xlu1 %v822_v61, %s5805_s11 }
  0xdd   : > { %1841 = vrot.lane.b32.xlu0 %v1831_v3, %s5805_s11  ;;  %1837 = vrot.lane.b32.xlu1 %v6043_v59, %s5805_s11  ;;  %v6219_v35 = vmul.u32.u64.low 3817748708, %v443_v57  ;;  %v6220_v3 = vmul.u32.u64.high 3817748708, %v443_v57, %v6219_v35 }
 0x123   : > { %v824_v5 = vpop.permute.xlu1 %823  ;;  %v507_v6 = vpop.permute.xlu0 %506 }
 0x127   : > { %v6079_v8 = vpop.permute.xlu1 %1161  ;;  %v993_v9 = vpop.permute.xlu0 %992 }
 0x12b   : > { %v511_v10 = vpop.permute.xlu1 %510  ;;  %v6084_v11 = vpop.permute.xlu0 %1330 }
 0x12c   : > { %5561 = vmatpush3.msk.msra.mxu1 %vm518_vm15, %v511_v10 }
 0x12d   : > { %5565 = vmatprep.subr.mxu1 %v5783_v0  ;;  %5563 = vmatmul.mubr.msk.f32.vlgmr.msra.gmra.mxu1 %vm514_vm0, %v5342_v4 }
 0x12e   : > { %5566 = vmatpush3.msk.msra.mxu1 %vm518_vm15, %v499_v60  ;;  %5567 = vmatprep.mubr.msk.f32.mxu1 %vm5800_vm13, %v5783_v0  ;;  %v445_v60 = vadd.s32 256, %v443_v57 }
 0x12f   : > { %v6095_v13 = vpop.permute.xlu1 %1499  ;;  %v509_v14 = vpop.permute.xlu0 %508  ;;  %5570 = vmatprep.subr.mxu1 %v5783_v0 }
 0x130   : > { %v513_v15 = vsel %vm296_vm14, %v509_v14, %v511_v10  ;;  %v512_v30 = vsel %vm296_vm14, %v507_v6, %v509_v14  ;;  %v6216_v2 = vmul.u32.u64.low 3817748708, %v445_v60  ;;  %v6217_v29 = vmul.u32.u64.high 3817748708, %v445_v60, %v6216_v2 }
 0x131   : > { %5343 = vmatprep.subr.msk.mxu0 %vm518_vm15, %v513_v15  ;;  %5568 = vmatmul.mubr.msk.f32.vlgmr.msra.gmra.mxu1 %vm514_vm0, %v500_v12  ;;  %v452_v14 = vshrl.u32 %v6220_v3, 4 }
 0x132   : > { %5344 = vmatpush1.msk.msra.mxu0 %vm518_vm15, %v512_v30  ;;  %5572 = vmatprep.mubr.msk.f32.mxu1 %vm5800_vm13, %v5783_v0 }
 0x133   : > { %v826_v16 = vpop.permute.xlu1 %825  ;;  %5345 = vmatmul.mubr.msk.f32.vlgmr.msra.gmra.mxu0 %vm514_vm0, %v5342_v4  ;;  %5348 = vmatprep.subr.msk.mxu0 %vm518_vm15, %v822_v61  ;;  %v6107_v17 = vpop.permute.xlu0 %1668 }
 0x134   : > { %5349 = vmatpush1.msk.msra.mxu0 %vm518_vm15, %v6043_v59  ;;  %739 = vmatprep.mubr.f32.mxu0 %v5783_v0  ;;  %v830_v22 = vsel %vm829_vm1, %v824_v5, %v826_v16 }
 0x137   : > { %v997_v19 = vpop.permute.xlu1 %996  ;;  %5350 = vmatmul.mubr.msk.f32.vlgmr.msra.gmra.mxu0 %vm514_vm0, %v500_v12  ;;  %v828_v20 = vpop.permute.xlu0 %827 }
 0x138   : > { %v831_v21 = vsel %vm829_vm1, %v826_v16, %v828_v20  ;;  %5571 = vmatpush3.msk.msra.mxu1 %vm518_vm15, %v828_v20  ;;  %905 = vmatprep.mubr.f32.mxu0 %v5783_v0  ;;  %v453_v20 = vmul.u32 18, %v452_v14 }
 0x139   : > { %5354 = vmatprep.subr.msk.mxu0 %vm518_vm15, %v831_v21  ;;  %5573 = vmatmul.mubr.msk.f32.vlgmr.msra.gmra.mxu1 %vm514_vm0, %v5353_v18 }
 0x13a   : > { %5575 = vmatprep.subr.mxu1 %v5783_v0  ;;  %5355 = vmatpush1.msk.msra.mxu0 %vm518_vm15, %v830_v22 }
 0x13b   : > { %5576 = vmatpush3.msk.msra.mxu1 %vm518_vm15, %v997_v19  ;;  %v1164_v24 = vpop.permute.xlu1 %1163  ;;  %5356 = vmatmul.mubr.msk.f32.vlgmr.msra.gmra.mxu0 %vm514_vm0, %v5353_v18  ;;  %v995_v25 = vpop.permute.xlu0 %994 }
 0x13c   : > { %v999_v36 = vsel %vm998_vm2, %v993_v9, %v995_v25  ;;  %v1000_v26 = vsel %vm998_vm2, %v995_v25, %v997_v19  ;;  %5577 = vmatprep.mubr.msk.f32.mxu1 %vm5800_vm13, %v5783_v0  ;;  %1074 = vmatprep.mubr.f32.mxu0 %v5783_v0  ;;  %v1168_v33 = vsel %vm6725_vm3, %v6079_v8, %v1164_v24 }
 0x13d   : > { %5360 = vmatprep.subr.msk.mxu0 %vm518_vm15, %v1000_v26  ;;  %5578 = vmatmul.mubr.msk.f32.vlgmr.msra.gmra.mxu1 %vm514_vm0, %v5359_v23  ;;  %v6222_v6 = vmul.u32.u64.low 3817748708, %v444_v63  ;;  %v6223_v8 = vmul.u32.u64.high 3817748708, %v444_v63, %v6222_v6 }
 0x13e   : > { %5361 = vmatpush1.msk.msra.mxu0 %vm518_vm15, %v999_v36  ;;  %5580 = vmatprep.subr.mxu1 %v5783_v0 }
 0x13f   : > { %v1335_v28 = vpop.permute.xlu1 %1334  ;;  %5362 = vmatmul.mubr.msk.f32.vlgmr.msra.gmra.mxu0 %vm514_vm0, %v5359_v23  ;;  %v1166_v31 = vpop.permute.xlu0 %1165  ;;  %5582 = vmatprep.mubr.msk.f32.mxu1 %vm5800_vm13, %v5783_v0  ;;  %v463_v16 = vshrl.u32 %v6223_v8, 4 }
 0x140   : > { %v1169_v32 = vsel %vm6725_vm3, %v1164_v24, %v1166_v31  ;;  %5581 = vmatpush3.msk.msra.mxu1 %vm518_vm15, %v1166_v31  ;;  %1243 = vmatprep.mubr.f32.mxu0 %v5783_v0 }
 0x141   : > { %5366 = vmatprep.subr.msk.mxu0 %vm518_vm15, %v1169_v32  ;;  %5583 = vmatmul.mubr.msk.f32.vlgmr.msra.gmra.mxu1 %vm514_vm0, %v5365_v27  ;;  %v464_v24 = vmul.u32 18, %v463_v16 }
 0x142   : > { %5585 = vmatprep.subr.mxu1 %v5783_v0  ;;  %5367 = vmatpush1.msk.msra.mxu0 %vm518_vm15, %v1168_v33 }
 0x143   : > { %5586 = vmatpush3.msk.msra.mxu1 %vm518_vm15, %v1335_v28  ;;  %v1502_v7 = vpop.permute.xlu1 %1501  ;;  %5368 = vmatmul.mubr.msk.f32.vlgmr.msra.gmra.mxu0 %vm514_vm0, %v5365_v27  ;;  %v1333_v37 = vpop.permute.xlu0 %1332  ;;  %v454_v27 = vsub.s32 %v443_v57, %v453_v20 }
 0x144   : > { %v1337_v38 = vsel %vm6724_vm4, %v6084_v11, %v1333_v37  ;;  %v1338_v39 = vsel %vm6724_vm4, %v1333_v37, %v1335_v28  ;;  %5587 = vmatprep.mubr.msk.f32.mxu1 %vm5800_vm13, %v5783_v0  ;;  %1412 = vmatprep.mubr.f32.mxu0 %v5783_v0  ;;  %v1506_v44 = vsel %vm6722_vm5, %v6095_v13, %v1502_v7  ;;  %v474_v13 = vshrl.u32 %v6217_v29, 4 }
 0x145   : > { %5372 = vmatprep.subr.msk.mxu0 %vm518_vm15, %v1338_v39  ;;  %5588 = vmatmul.mubr.msk.f32.vlgmr.msra.gmra.mxu1 %vm514_vm0, %v5371_v34  ;;  %vm479_vm10 = vcmp.ne.s32.totalorder %v454_v27, 0  ;;  %vm482_vm11 = vcmp.lt.s32.totalorder %v454_v27, 0  ;;  %vm2091_vm4 = vcmask 154624  }
 0x146   : > { %5373 = vmatpush1.msk.msra.mxu0 %vm518_vm15, %v1337_v38  ;;  %5590 = vmatprep.subr.mxu1 %v5783_v0  ;;  %v475_v19 = vmul.u32 18, %v474_v13 }
 0x147   : > { %v1673_v41 = vpop.permute.xlu1 %1672  ;;  %5374 = vmatmul.mubr.msk.f32.vlgmr.msra.gmra.mxu0 %vm514_vm0, %v5371_v34  ;;  %v1504_v42 = vpop.permute.xlu0 %1503  ;;  %5592 = vmatprep.mubr.msk.f32.mxu1 %vm5800_vm13, %v5783_v0  ;;  %v465_v34 = vsub.s32 %v444_v63, %v464_v24 }
 0x148   : > { %v1507_v43 = vsel %vm6722_vm5, %v1502_v7, %v1504_v42  ;;  %5591 = vmatpush3.msk.msra.mxu1 %vm518_vm15, %v1504_v42  ;;  %1581 = vmatprep.mubr.f32.mxu0 %v5783_v0  ;;  %v476_v26 = vsub.s32 %v445_v60, %v475_v19  ;;  %vm6234_vm5 = vmand %vm482_vm11, %vm479_vm10 }
 0x149   : > { %5378 = vmatprep.subr.msk.mxu0 %vm518_vm15, %v1507_v43  ;;  %5593 = vmatmul.mubr.msk.f32.vlgmr.msra.gmra.mxu1 %vm514_vm0, %v5377_v40  ;;  %vm480_vm12 = vcmp.ne.s32.totalorder %v465_v34, 0 }
 0x14a   : > { %5595 = vmatprep.subr.mxu1 %v5783_v0  ;;  %5379 = vmatpush1.msk.msra.mxu0 %vm518_vm15, %v1506_v44  ;;  %vm481_vm8 = vcmp.ne.s32.totalorder %v476_v26, 0  ;;  %vm484_vm9 = vcmp.lt.s32.totalorder %v476_v26, 0 }
 0x14b   : > { %5596 = vmatpush3.msk.msra.mxu1 %vm518_vm15, %v1673_v41  ;;  %v1840_v46 = vpop.permute.xlu1 %1839  ;;  %5380 = vmatmul.mubr.msk.f32.vlgmr.msra.gmra.mxu0 %vm514_vm0, %v5377_v40  ;;  %v1671_v47 = vpop.permute.xlu0 %1670 }
 0x14c   : > { %v1675_v48 = vsel %vm6721_vm6, %v6107_v17, %v1671_v47  ;;  %v1676_v49 = vsel %vm6721_vm6, %v1671_v47, %v1673_v41  ;;  %5597 = vmatprep.mubr.msk.f32.mxu1 %vm5800_vm13, %v5783_v0  ;;  %1750 = vmatprep.mubr.f32.mxu0 %v5783_v0  ;;  %v488_v47 = vadd.s32 18, %v454_v27  ;;  %vm483_vm6 = vcmp.lt.s32.totalorder %v465_v34, 0 }
 0x14d   : > { %5384 = vmatprep.subr.msk.mxu0 %vm518_vm15, %v1676_v49  ;;  %5598 = vmatmul.mubr.msk.f32.vlgmr.msra.gmra.mxu1 %vm514_vm0, %v5383_v45 }
 0x14e   : > { %5385 = vmatpush1.msk.msra.mxu0 %vm518_vm15, %v1675_v48  ;;  %5600 = vmatprep.subr.mxu1 %v5783_v0  ;;  %v491_v29 = vsel %vm6234_vm5, %v488_v47, %v454_v27 }
 0x14f   : > { %v1838_v51 = vpop.permute.xlu1 %1837  ;;  %5386 = vmatmul.mubr.msk.f32.vlgmr.msra.gmra.mxu0 %vm514_vm0, %v5383_v45  ;;  %v1842_v52 = vpop.permute.xlu0 %1841  ;;  %5602 = vmatprep.mubr.msk.f32.mxu1 %vm5800_vm13, %v5783_v0 }
 0x150   : > { %v1844_v53 = vsel %vm6720_vm7, %v1838_v51, %v1840_v46  ;;  %v1845_v54 = vsel %vm6720_vm7, %v1840_v46, %v1842_v52  ;;  %5601 = vmatpush3.msk.msra.mxu1 %vm518_vm15, %v1842_v52  ;;  %1919 = vmatprep.mubr.f32.mxu0 %v5783_v0  ;;  %v490_v46 = vadd.s32 18, %v476_v26  ;;  %vm6229_vm7 = vmand %vm484_vm9, %vm481_vm8  ;;  %vm6723_vm9 = vcmask 257024  }
 0x151   : > { %5390 = vmatprep.subr.msk.mxu0 %vm518_vm15, %v1845_v54  ;;  %5603 = vmatmul.mubr.msk.f32.vlgmr.msra.gmra.mxu1 %vm514_vm0, %v5389_v50  ;;  %vm6241_vm8 = vmand %vm483_vm6, %vm480_vm12  ;;  %vm6253_vm6 = vcmp.lt.s32.totalorder %v491_v29, 16 }
 0x152   : > { %5391 = vmatpush1.msk.msra.mxu0 %vm518_vm15, %v1844_v53  ;;  %5605 = vmatprep.subr.mxu1 %v5783_v0 }
 0x153   : > { %5392 = vmatmul.mubr.msk.f32.vlgmr.msra.gmra.mxu0 %vm514_vm0, %v5389_v50  ;;  %5607 = vmatprep.mubr.msk.f32.mxu1 %vm5800_vm13, %v5783_v0 }
 0x154   : > { %2192 = vmatprep.mubr.f32.mxu0 %v5783_v0 }
 0x1ed   : > { %v662_v56 = vpop.f32.mrf.mxu1 }
 0x1ef   : > { %v5564_v58 = vpop.f32.mrf.mxu1 }
 0x1f0   : > { %v489_v58 = vadd.s32 18, %v465_v34 }
 0x1f1   : > { %v812_v59 = vpop.f32.mrf.mxu1 }
 0x1f2   : > { %v813_v21 = vadd.f32 %v812_v59, %v662_v56 }
 0x1f3   : > { %v591_v61 = vpop.f32.mrf.mxu0  ;;  %v5569_v62 = vpop.f32.mrf.mxu1 }
 0x1f5   : > { %v593_v1 = vpop.f32.mrf.mxu0 }
 0x1f7   : > { %v741_v5 = vpop.f32.mrf.mxu0 }
 0x1f8   : > { %v742_v28 = vadd.f32 %v741_v5, %v591_v61  ;;  %v493_v61 = vsel %vm6229_vm7, %v490_v46, %v476_v26 }
 0x1f9   : > { %v743_v0 = vpop.f32.mrf.mxu0  ;;  %v978_v9 = vpop.f32.mrf.mxu1  ;;  %vm6249_vm7 = vcmp.lt.s32.totalorder %v493_v61, 16  ;;  %v5809_v61 = vmov 2  }
 0x1fa   : > { %v984_v31 = vadd.f32 %v978_v9, %v813_v21  ;;  %v744_v7 = vadd.f32 %v743_v0, %v593_v1  ;;  %v492_v0 = vsel %vm6241_vm8, %v489_v58, %v465_v34  ;;  %vm2096_vm8 = vcmask 1043608  }
 0x1fb   : > { %v907_v4 = vpop.f32.mrf.mxu0  ;;  %v5574_v10 = vpop.f32.mrf.mxu1  ;;  %vm6257_vm5 = vcmp.lt.s32.totalorder %v492_v0, 16 }
 0x1fc   : > { %v982_v37 = vadd.f32 %v907_v4, %v742_v28 }
 0x1fd   : > { %v909_v11 = vpop.f32.mrf.mxu0  ;;  %v1147_v12 = vpop.f32.mrf.mxu1 }
 0x1fe   : > { %v1153_v38 = vadd.f32 %v1147_v12, %v984_v31  ;;  %v983_v41 = vadd.f32 %v909_v11, %v744_v7 }
 0x1ff   : > { %v1076_v15 = vpop.f32.mrf.mxu0  ;;  %v5579_v30 = vpop.f32.mrf.mxu1 }
 0x200   : > { %v1151_v42 = vadd.f32 %v1076_v15, %v982_v37 }
 0x201   : > { %v1078_v17 = vpop.f32.mrf.mxu0  ;;  %v1316_v18 = vpop.f32.mrf.mxu1 }
 0x202   : > { %v1322_v43 = vadd.f32 %v1316_v18, %v1153_v38  ;;  %v1152_v48 = vadd.f32 %v1078_v17, %v983_v41 }
 0x203   : > { %v1245_v22 = vpop.f32.mrf.mxu0  ;;  %v5584_v23 = vpop.f32.mrf.mxu1 }
 0x204   : > { %v1320_v49 = vadd.f32 %v1245_v22, %v1151_v42 }
 0x205   : > { %v1247_v25 = vpop.f32.mrf.mxu0  ;;  %v1485_v36 = vpop.f32.mrf.mxu1 }
 0x206   : > { %v1491_v50 = vadd.f32 %v1485_v36, %v1322_v43  ;;  %v1321_v55 = vadd.f32 %v1247_v25, %v1152_v48 }
 0x207   : > { %v1414_v32 = vpop.f32.mrf.mxu0  ;;  %v5589_v33 = vpop.f32.mrf.mxu1 }
 0x208   : > { %v1489_v56 = vadd.f32 %v1414_v32, %v1320_v49  ;;  %v5806_v33 = vmov 0  }
 0x209   : > { %v1416_v39 = vpop.f32.mrf.mxu0  ;;  %v1654_v40 = vpop.f32.mrf.mxu1  ;;  %5749 = vset.pattern.permute.xlu1 %v5806_v33 }
 0x20a   : > { %v1660_v57 = vadd.f32 %v1654_v40, %v1491_v50  ;;  %v1490_v63 = vadd.f32 %v1416_v39, %v1321_v55 }
 0x20b   : > { %v1583_v44 = vpop.f32.mrf.mxu0  ;;  %v5594_v45 = vpop.f32.mrf.mxu1 }
 0x20c   : > { %v1658_v1 = vadd.f32 %v1583_v44, %v1489_v56  ;;  %v5807_v56 = vmov 1  }
 0x20d   : > { %v1585_v52 = vpop.f32.mrf.mxu0  ;;  %v1823_v53 = vpop.f32.mrf.mxu1  ;;  %5750 = vset.pattern.permute.xlu0 %v5807_v56 }
 0x20e   : > { %v1829_v2 = vadd.f32 %v1823_v53, %v1660_v57  ;;  %v1659_v5 = vadd.f32 %v1585_v52, %v1490_v63  ;;  %v6288_v57 = vld [vmem:[%s6718_s2] sm:$0xf] }
 0x20f   : > { %v1752_v59 = vpop.f32.mrf.mxu0  ;;  %v5599_v60 = vpop.f32.mrf.mxu1 }
 0x210   : > { %v1827_v6 = vadd.f32 %v1752_v59, %v1658_v1 }
 0x211   : > { %v1754_v35 = vpop.f32.mrf.mxu0  ;;  %v1992_v3 = vpop.f32.mrf.mxu1 }
 0x212   : > { %v1998_v8 = vadd.f32 %v1992_v3, %v1829_v2  ;;  %v1828_v12 = vadd.f32 %v1754_v35, %v1659_v5 }
 0x213   : > { %v1921_v10 = vpop.f32.mrf.mxu0  ;;  %v5604_v11 = vpop.f32.mrf.mxu1 }
 0x214   : > { %v1996_v13 = vadd.f32 %v1921_v10, %v1827_v6  ;;  %v6263_v30 = vsel %vm6249_vm7, %v1998_v8, 0.0 }
 0x215   : > { %v1923_v15 = vpop.f32.mrf.mxu0  ;;  %v2020_v23 = vmul.f32 %v6263_v30, %v6263_v30  ;;  %v2006_v25 = vsel %vm6723_vm9, %v6263_v30, 0.0 }
 0x216   : > { %v6267_v16 = vsel %vm6253_vm6, %v1996_v13, 0.0  ;;  %v1997_v17 = vadd.f32 %v1923_v15, %v1828_v12 }
 0x217   : > { %v2018_v18 = vmul.f32 %v6267_v16, %v6267_v16  ;;  %v2002_v21 = vsel %vm518_vm15, %v6267_v16, 0.0  ;;  %v2024_v31 = vsel %vm6723_vm9, %v2020_v23, 0.0  ;;  %vm2097_vm9 = vcmask 1047556  }
 0x218   : > { %v2000_v19 = vsel %vm6257_vm5, %v1997_v17, 0.0 }
 0x219   : > { %v2019_v20 = vmul.f32 %v2000_v19, %v2000_v19  ;;  %v2003_v22 = vsel %vm518_vm15, %v2000_v19, 0.0  ;;  %v2021_v36 = vsel %vm518_vm15, %v2018_v18, 0.0 }
 0x21a   : > { %v2004_v24 = vadd.f32 %v2003_v22, %v2002_v21 }
 0x21b   : > { %v2022_v26 = vsel %vm518_vm15, %v2019_v20, 0.0 }
 0x21c   : > { %v2007_v27 = vadd.f32 %v2006_v25, %v2004_v24  ;;  %v2023_v28 = vadd.f32 %v2022_v26, %v2021_v36 }
 0x21e   : > { %2008 = vadd.xlane.f32.xlu0 %v2007_v27  ;;  %v2025_v32 = vadd.f32 %v2024_v31, %v2023_v28 }
 0x220   : > { %2026 = vadd.xlane.f32.xlu1 %v2025_v32 }
 0x2a7   : > { %v2009_v34 = vpop.xlane.xlu0 %2008 }
 0x2a8   : > { %v2010_v7 = vrot.slane %v2009_v34, 4 }
 0x2a9   : > { %v2027_v37 = vpop.xlane.xlu1 %2026 }
 0x2aa   : > { %v2011_v38 = vadd.f32 %v2010_v7, %v2009_v34  ;;  %v2028_v39 = vrot.slane %v2027_v37, 4 }
 0x2ac   : > { %v2012_v40 = vrot.slane %v2011_v38, 2  ;;  %v2029_v41 = vadd.f32 %v2028_v39, %v2027_v37  ;;  %v5396_v39 = vld [vmem:[%s6717_s1 + $0x28] sm:$0xf] }
 0x2ae   : > { %v2030_v42 = vrot.slane %v2029_v41, 2  ;;  %v2013_v43 = vadd.f32 %v2012_v40, %v2011_v38 }
 0x2b0   : > { %v2014_v44 = vrot.slane %v2013_v43, 1  ;;  %v2031_v45 = vadd.f32 %v2030_v42, %v2029_v41  ;;  %v6360_v42 = vld [vmem:[#allocation4] sm:$0xff] }
 0x2b2   : > { %v2015_v46 = vadd.f32 %v2014_v44, %v2013_v43  ;;  %v2032_v47 = vrot.slane %v2031_v45, 1  ;;  %v5395_v43 = vld [vmem:[%s6717_s1 + $0x24] sm:$0xf] }
 0x2b4   : > { %5702 = vpush %v2015_v46  ;;  %v2033_v48 = vadd.f32 %v2032_v47, %v2031_v45  ;;  %v5407_v46 = vld [vmem:[%s6717_s1 + $0x2c] sm:$0xf] }
 0x2b6   : > { %5704 = vpush %v2033_v48 }
 0x2e5   : > { %s5703_s16 = spop %5702 }
 0x2e6   : > { %v2017_v49 = vstv %s5703_s16 }
 0x2e7   : > { %v2036_v50 = vmul.f32 0.0009765625, %v2017_v49  ;;  %s5705_s17 = spop %5704  ;;  %v5413_v49 = vld [vmem:[%s6717_s1 + $0x30] sm:$0xf] }
 0x2e8   : > { %v2035_v51 = vstv %s5705_s17 }
 0x2e9   : > { %v2038_v52 = vmul.f32 %v2036_v50, %v2036_v50  ;;  %v2037_v53 = vmul.f32 0.0009765625, %v2035_v51 }
 0x2eb   : > { %v2039_v54 = vsub.f32 %v2037_v53, %v2038_v52 }
 0x2ed   : > { %v2040_v55 = vadd.f32 1e-05, %v2039_v54 }
 0x2ef   : > { %5767 = vrsqrt.f32 %v2040_v55 }
 0x2fc   : > { %v5768_v58 = vpop.eup %5767 }
 0x2fd   : > { %v2042_v59 = vmul.f32 %v5768_v58, %v6288_v57  ;;  %v5419_v58 = vld [vmem:[%s6717_s1 + $0x34] sm:$0xf] }
 0x2ff   : > { %2051 = vperm.xlu1 %5749, %v2042_v59   ;;  %v2043_v60 = vmul.f32 %v2042_v59, %v2036_v50 }
 0x301   : > { %2045 = vrot.lane.b32.xlu0 %v2043_v60, %s5808_s21 }
 0x303   : > { %5751 = vset.pattern.permute.xlu1 %v5809_v61 }
 0x304   : > { %2070 = vperm.xlu1 %5751, %v6288_v57  }
 0x308   : > { %5752 = vset.pattern.permute.xlu1 %v5806_v33 }
 0x373   : > { %v2046_v62 = vpop.permute.xlu0 %2045 }
 0x374   : > { %v2048_v63 = vsub.f32 %v6288_v57, %v2046_v62 }
 0x376   : > { %2059 = vperm.xlu0 %5750, %v2048_v63   ;;  %v5425_v63 = vld [vmem:[%s6717_s1 + $0x38] sm:$0xf] }
 0x37a   : > { %v2052_v1 = vpop.permute.xlu1 %2051 }
 0x37b   : > { %v2054_v2 = vmul.f32 %v2052_v1, %v6267_v16  ;;  %v2055_v29 = vmul.f32 %v2052_v1, %v2000_v19  ;;  %v2056_v35 = vmul.f32 %v2052_v1, %v6263_v30 }
 0x37f   : > { %v6297_v5 = vpop.permute.xlu1 %2070 }
 0x3f1   : > { %v2060_v3 = vpop.permute.xlu0 %2059 }
 0x3f2   : > { %v2062_v6 = vadd.f32 %v2060_v3, %v2054_v2  ;;  %v2063_v8 = vadd.f32 %v2060_v3, %v2055_v29  ;;  %v2064_v0 = vadd.f32 %v2060_v3, %v2056_v35 }
 0x3f4   : > { %vm2065_vm10 = vcmp.ge.f32.partialorder %v2062_v6, 0.0  ;;  %vm2066_vm11 = vcmp.ge.f32.partialorder %v2063_v8, 0.0  ;;  %vm2067_vm12 = vcmp.ge.f32.partialorder %v2064_v0, 0.0  ;;  %v2075_v10 = vmul.f32 %v6297_v5, %v2064_v0 }
 0x3f5   : > { %v2073_v11 = vmul.f32 %v6297_v5, %v2062_v6  ;;  %v2074_v12 = vmul.f32 %v6297_v5, %v2063_v8 }
 0x3f6   : > { %v2078_v13 = vsel %vm2067_vm12, %v2064_v0, %v2075_v10  ;;  %vm6310_vm12 = vmor %vm2097_vm9, %vm2096_vm8  ;;  %vm6740_vm9 = vcmask 883712   ;;  %vm6742_vm8 = vcmask 752640  }
 0x3f7   : > { %v2081_v15 = vsel %vm6249_vm7, %v2078_v13, 0.0  ;;  %v2076_v30 = vsel %vm2065_vm10, %v2062_v6, %v2073_v11  ;;  %v2077_v16 = vsel %vm2066_vm11, %v2063_v8, %v2074_v12  ;;  %vm2100_vm10 = vcmask 412672   ;;  %v5431_v6 = vld [vmem:[%s6717_s1 + $0x3c] sm:$0xf]  ;;  %vm6741_vm11 = vmmov %vm6740_vm9 }
 0x3f8   : > { %2088 = vrot.lane.b32.xlu0 %v2081_v15, %s5785_s19  ;;  %v2079_v17 = vsel %vm6253_vm6, %v2076_v30, 0.0  ;;  %v2080_v18 = vsel %vm6257_vm5, %v2077_v16, 0.0  ;;  %v5437_v16 = vld [vmem:[%s6717_s1 + $0x40] sm:$0xf] }
 0x3f9   : > { %v2085_v19 = vcombine.low %v2079_v17, %v2080_v18 }
 0x3fb   : > { %2086 = vrot.lane.b32.xlu1 %v2085_v19, %s5785_s19 }
 0x46a   : > { %v2089_v23 = vpop.permute.xlu0 %2088 }
 0x46d   : > { %v2087_v20 = vpop.permute.xlu1 %2086 }
 0x46e   : > { %v2090_v22 = vrot.slane %v2087_v20, 4 }
 0x470   : > { %v2092_v24 = vsel %vm2091_vm4, %v2090_v22, %v2087_v20  ;;  %v2093_v25 = vsel %vm2091_vm4, %v2090_v22, %v2089_v23 }
 0x471   : > { %2099 = vst.msk [vmem:[#allocation3] sm:$0xff] %vm6310_vm12, %v2092_v24 }
 0x472   : > { %2101 = vst.msk [vmem:[#allocation3 + $0x8] sm:$0xf] %vm2100_vm10, %v2093_v25  ;;  %v5443_v25 = vld [vmem:[%s6717_s1 + $0x44] sm:$0xf] }
 0x478   : > { %v6319_v26 = vld [vmem:[#allocation3] sm:$0xff] }
 0x479   : > { %v2103_v36 = vld [vmem:[#allocation3 + $0x8] sm:$0xf]  ;;  %2111 = vrot.lane.b32.xlu1 %v6319_v26, %s5791_s25  ;;  %v2425_v31 = vcombine.high %v6319_v26, %v6319_v26 }
 0x47a   : > { %2115 = vrot.lane.b32.xlu0 %v2103_v36, %s5791_s25  ;;  %v2420_v27 = vld [vmem:[#allocation3 + $0x8] sm:$0xf] }
 0x47b   : > { %v2588_v28 = vld [vmem:[#allocation3 + $0x8] sm:$0xf] }
 0x47c   : > { %v2756_v32 = vld [vmem:[#allocation3 + $0x8] sm:$0xf] }
 0x47d   : > { %2430 = vrot.lane.b32.xlu1 %v2420_v27, %s5801_s7  ;;  %v2924_v34 = vld [vmem:[#allocation3 + $0x8] sm:$0xf] }
 0x47e   : > { %2426 = vrot.lane.b32.xlu0 %v6319_v26, %s5801_s7  ;;  %v3092_v7 = vld [vmem:[#allocation3 + $0x8] sm:$0xf] }
 0x47f   : > { %v3260_v37 = vld [vmem:[#allocation3 + $0x8] sm:$0xf] }
 0x480   : > { %v3428_v38 = vld [vmem:[#allocation3 + $0x8] sm:$0xf] }
 0x481   : > { %2594 = vrot.lane.b32.xlu1 %v6319_v26, %s5802_s8 }
 0x482   : > { %2598 = vrot.lane.b32.xlu0 %v2588_v28, %s5802_s8 }
 0x485   : > { %2113 = vrot.lane.b32.xlu1 %v2425_v31, %s5791_s25 }
 0x486   : > { %2762 = vrot.lane.b32.xlu0 %v6319_v26, %s5793_s27 }
 0x489   : > { %2766 = vrot.lane.b32.xlu1 %v2756_v32, %s5793_s27 }
 0x48a   : > { %2428 = vrot.lane.b32.xlu0 %v2425_v31, %s5801_s7 }
 0x48d   : > { %2930 = vrot.lane.b32.xlu1 %v6319_v26, %s5803_s9 }
 0x48e   : > { %2934 = vrot.lane.b32.xlu0 %v2924_v34, %s5803_s9 }
 0x491   : > { %2596 = vrot.lane.b32.xlu1 %v2425_v31, %s5802_s8 }
 0x492   : > { %2764 = vrot.lane.b32.xlu0 %v2425_v31, %s5793_s27 }
 0x495   : > { %3102 = vrot.lane.b32.xlu1 %v3092_v7, %s5804_s10 }
 0x496   : > { %3098 = vrot.lane.b32.xlu0 %v6319_v26, %s5804_s10 }
 0x499   : > { %2932 = vrot.lane.b32.xlu1 %v2425_v31, %s5803_s9 }
 0x49a   : > { %3100 = vrot.lane.b32.xlu0 %v2425_v31, %s5804_s10 }
 0x49d   : > { %3266 = vrot.lane.b32.xlu1 %v6319_v26, %s5790_s24 }
 0x49e   : > { %3270 = vrot.lane.b32.xlu0 %v3260_v37, %s5790_s24 }
 0x4a1   : > { %3268 = vrot.lane.b32.xlu1 %v2425_v31, %s5790_s24 }
 0x4a2   : > { %3436 = vrot.lane.b32.xlu0 %v2425_v31, %s5805_s11 }
 0x4a5   : > { %3438 = vrot.lane.b32.xlu1 %v3428_v38, %s5805_s11 }
 0x4a6   : > { %3434 = vrot.lane.b32.xlu0 %v6319_v26, %s5805_s11 }
 0x4eb   : > { %v2112_v41 = vpop.permute.xlu1 %2111 }
 0x4ec   : > { %v2116_v40 = vpop.permute.xlu0 %2115 }
 0x4ed   : > { %5606 = vmatpush3.msk.msra.mxu1 %vm518_vm15, %v2116_v40 }
 0x4ee   : > { %5608 = vmatmul.mubr.msk.f32.vlgmr.msra.gmra.mxu1 %vm514_vm0, %v5396_v39  ;;  %5610 = vmatprep.subr.mxu1 %v6360_v42 }
 0x4ef   : > { %5611 = vmatpush3.msk.msra.mxu1 %vm518_vm15, %v2103_v36  ;;  %5612 = vmatprep.mubr.msk.f32.mxu1 %vm5800_vm13, %v6360_v42  ;;  %v2431_v45 = vpop.permute.xlu1 %2430 }
 0x4f0   : > { %v2427_v44 = vpop.permute.xlu0 %2426  ;;  %5615 = vmatprep.subr.mxu1 %v6360_v42 }
 0x4f2   : > { %5613 = vmatmul.mubr.msk.f32.vlgmr.msra.gmra.mxu1 %vm514_vm0, %v5395_v43 }
 0x4f3   : > { %5616 = vmatpush3.msk.msra.mxu1 %vm518_vm15, %v2431_v45  ;;  %5617 = vmatprep.mubr.msk.f32.mxu1 %vm5800_vm13, %v6360_v42  ;;  %v2595_v48 = vpop.permute.xlu1 %2594 }
 0x4f4   : > { %v2599_v47 = vpop.permute.xlu0 %2598  ;;  %5620 = vmatprep.subr.mxu1 %v6360_v42 }
 0x4f6   : > { %5618 = vmatmul.mubr.msk.f32.vlgmr.msra.gmra.mxu1 %vm514_vm0, %v5407_v46 }
 0x4f7   : > { %5621 = vmatpush3.msk.msra.mxu1 %vm518_vm15, %v2599_v47  ;;  %5622 = vmatprep.mubr.msk.f32.mxu1 %vm5800_vm13, %v6360_v42  ;;  %v2114_v51 = vpop.permute.xlu1 %2113 }
 0x4f8   : > { %v2763_v50 = vpop.permute.xlu0 %2762  ;;  %5625 = vmatprep.subr.mxu1 %v6360_v42  ;;  %v2117_v52 = vsel %vm296_vm14, %v2112_v41, %v2114_v51  ;;  %v2118_v53 = vsel %vm296_vm14, %v2114_v51, %v2116_v40 }
 0x4f9   : > { %5397 = vmatprep.subr.msk.mxu0 %vm518_vm15, %v2118_v53 }
 0x4fa   : > { %5623 = vmatmul.mubr.msk.f32.vlgmr.msra.gmra.mxu1 %vm514_vm0, %v5413_v49  ;;  %5398 = vmatpush1.msk.msra.mxu0 %vm518_vm15, %v2117_v52 }
 0x4fb   : > { %5627 = vmatprep.mubr.msk.f32.mxu1 %vm5800_vm13, %v6360_v42  ;;  %5399 = vmatmul.mubr.msk.f32.vlgmr.msra.gmra.mxu0 %vm514_vm0, %v5396_v39  ;;  %v2767_v55 = vpop.permute.xlu1 %2766 }
 0x4fc   : > { %v2429_v54 = vpop.permute.xlu0 %2428  ;;  %5402 = vmatprep.subr.msk.mxu0 %vm518_vm15, %v2425_v31  ;;  %5626 = vmatpush3.msk.msra.mxu1 %vm518_vm15, %v2767_v55 }
 0x4fd   : > { %v2433_v59 = vsel %vm829_vm1, %v2429_v54, %v2431_v45  ;;  %5403 = vmatpush1.msk.msra.mxu0 %vm518_vm15, %v6319_v26  ;;  %2342 = vmatprep.mubr.f32.mxu0 %v6360_v42  ;;  %v2432_v60 = vsel %vm829_vm1, %v2427_v44, %v2429_v54 }
 0x4fe   : > { %5408 = vmatprep.subr.msk.mxu0 %vm518_vm15, %v2433_v59  ;;  %5630 = vmatprep.subr.mxu1 %v6360_v42 }
 0x4ff   : > { %5628 = vmatmul.mubr.msk.f32.vlgmr.msra.gmra.mxu1 %vm514_vm0, %v5419_v58  ;;  %5404 = vmatmul.mubr.msk.f32.vlgmr.msra.gmra.mxu0 %vm514_vm0, %v5395_v43  ;;  %v2931_v62 = vpop.permute.xlu1 %2930 }
 0x500   : > { %v2935_v61 = vpop.permute.xlu0 %2934  ;;  %5632 = vmatprep.mubr.msk.f32.mxu1 %vm5800_vm13, %v6360_v42  ;;  %5409 = vmatpush1.msk.msra.mxu0 %vm518_vm15, %v2432_v60 }
 0x501   : > { %5631 = vmatpush3.msk.msra.mxu1 %vm518_vm15, %v2935_v61  ;;  %2507 = vmatprep.mubr.f32.mxu0 %v6360_v42 }
 0x502   : > { %5635 = vmatprep.subr.mxu1 %v6360_v42 }
 0x503   : > { %5633 = vmatmul.mubr.msk.f32.vlgmr.msra.gmra.mxu1 %vm514_vm0, %v5425_v63  ;;  %5410 = vmatmul.mubr.msk.f32.vlgmr.msra.gmra.mxu0 %vm514_vm0, %v5407_v46  ;;  %v2597_v2 = vpop.permute.xlu1 %2596 }
 0x504   : > { %v2765_v1 = vpop.permute.xlu0 %2764  ;;  %5637 = vmatprep.mubr.msk.f32.mxu1 %vm5800_vm13, %v6360_v42  ;;  %v2600_v29 = vsel %vm998_vm2, %v2595_v48, %v2597_v2  ;;  %v2601_v35 = vsel %vm998_vm2, %v2597_v2, %v2599_v47  ;;  %2675 = vmatprep.mubr.f32.mxu0 %v6360_v42 }
 0x505   : > { %5414 = vmatprep.subr.msk.mxu0 %vm518_vm15, %v2601_v35  ;;  %v2769_v3 = vsel %vm6725_vm3, %v2765_v1, %v2767_v55  ;;  %v2768_v8 = vsel %vm6725_vm3, %v2763_v50, %v2765_v1  ;;  %vm6743_vm3 = vmmov %vm6742_vm8 }
 0x506   : > { %5415 = vmatpush1.msk.msra.mxu0 %vm518_vm15, %v2600_v29 }
 0x507   : > { %5416 = vmatmul.mubr.msk.f32.vlgmr.msra.gmra.mxu0 %vm514_vm0, %v5413_v49  ;;  %5420 = vmatprep.subr.msk.mxu0 %vm518_vm15, %v2769_v3  ;;  %v3103_v10 = vpop.permute.xlu1 %3102 }
 0x508   : > { %v3099_v0 = vpop.permute.xlu0 %3098  ;;  %5421 = vmatpush1.msk.msra.mxu0 %vm518_vm15, %v2768_v8  ;;  %5636 = vmatpush3.msk.msra.mxu1 %vm518_vm15, %v3103_v10 }
 0x509   : > { %5638 = vmatmul.mubr.msk.f32.vlgmr.msra.gmra.mxu1 %vm514_vm0, %v5431_v6  ;;  %2843 = vmatprep.mubr.f32.mxu0 %v6360_v42 }
 0x50a   : > { %5640 = vmatprep.subr.mxu1 %v6360_v42  ;;  %5642 = vmatprep.mubr.msk.f32.mxu1 %vm5800_vm13, %v6360_v42 }
 0x50b   : > { %5422 = vmatmul.mubr.msk.f32.vlgmr.msra.gmra.mxu0 %vm514_vm0, %v5419_v58  ;;  %v2933_v12 = vpop.permute.xlu1 %2932 }
 0x50c   : > { %v3101_v11 = vpop.permute.xlu0 %3100  ;;  %v2936_v13 = vsel %vm6740_vm9, %v2931_v62, %v2933_v12  ;;  %v2937_v15 = vsel %vm6741_vm11, %v2933_v12, %v2935_v61  ;;  %3011 = vmatprep.mubr.f32.mxu0 %v6360_v42  ;;  %vm6746_vm11 = vcmask 736256  }
 0x50d   : > { %5426 = vmatprep.subr.msk.mxu0 %vm518_vm15, %v2937_v15  ;;  %v3105_v30 = vsel %vm6742_vm8, %v3101_v11, %v3103_v10  ;;  %v3104_v17 = vsel %vm6743_vm3, %v3099_v0, %v3101_v11  ;;  %vm6744_vm3 = vcmask 744448   ;;  %vm6747_vm8 = vmmov %vm6746_vm11 }
 0x50e   : > { %5427 = vmatpush1.msk.msra.mxu0 %vm518_vm15, %v2936_v13  ;;  %vm6745_vm9 = vmmov %vm6744_vm3 }
 0x50f   : > { %5428 = vmatmul.mubr.msk.f32.vlgmr.msra.gmra.mxu0 %vm514_vm0, %v5425_v63  ;;  %5432 = vmatprep.subr.msk.mxu0 %vm518_vm15, %v3105_v30  ;;  %v3267_v19 = vpop.permute.xlu1 %3266 }
 0x510   : > { %v3271_v18 = vpop.permute.xlu0 %3270  ;;  %5433 = vmatpush1.msk.msra.mxu0 %vm518_vm15, %v3104_v17  ;;  %3179 = vmatprep.mubr.f32.mxu0 %v6360_v42 }
 0x511   : > { %5641 = vmatpush3.msk.msra.mxu1 %vm518_vm15, %v3271_v18 }
 0x512   : > { %5643 = vmatmul.mubr.msk.f32.vlgmr.msra.gmra.mxu1 %vm514_vm0, %v5437_v16  ;;  %5645 = vmatprep.subr.mxu1 %v6360_v42 }
 0x513   : > { %5647 = vmatprep.mubr.msk.f32.mxu1 %vm5800_vm13, %v6360_v42  ;;  %5434 = vmatmul.mubr.msk.f32.vlgmr.msra.gmra.mxu0 %vm514_vm0, %v5431_v6  ;;  %v3269_v22 = vpop.permute.xlu1 %3268 }
 0x514   : > { %v3437_v20 = vpop.permute.xlu0 %3436  ;;  %v3272_v23 = vsel %vm6744_vm3, %v3267_v19, %v3269_v22  ;;  %v3273_v24 = vsel %vm6745_vm9, %v3269_v22, %v3271_v18  ;;  %3347 = vmatprep.mubr.f32.mxu0 %v6360_v42  ;;  %vm6748_vm3 = vcmask 257024  }
 0x515   : > { %5438 = vmatprep.subr.msk.mxu0 %vm518_vm15, %v3273_v24  ;;  %vm6749_vm9 = vmmov %vm6748_vm3 }
 0x516   : > { %5439 = vmatpush1.msk.msra.mxu0 %vm518_vm15, %v3272_v23 }
 0x517   : > { %5440 = vmatmul.mubr.msk.f32.vlgmr.msra.gmra.mxu0 %vm514_vm0, %v5437_v16  ;;  %v3439_v26 = vpop.permute.xlu1 %3438 }
 0x518   : > { %v3435_v36 = vpop.permute.xlu0 %3434  ;;  %v3441_v28 = vsel %vm6747_vm8, %v3437_v20, %v3439_v26  ;;  %5646 = vmatpush3.msk.msra.mxu1 %vm518_vm15, %v3439_v26  ;;  %3515 = vmatprep.mubr.f32.mxu0 %v6360_v42 }
 0x519   : > { %v3440_v27 = vsel %vm6746_vm11, %v3435_v36, %v3437_v20  ;;  %5444 = vmatprep.subr.msk.mxu0 %vm518_vm15, %v3441_v28  ;;  %5648 = vmatmul.mubr.msk.f32.vlgmr.msra.gmra.mxu1 %vm514_vm0, %v5443_v25 }
 0x51a   : > { %5445 = vmatpush1.msk.msra.mxu0 %vm518_vm15, %v3440_v27  ;;  %5650 = vmatprep.subr.mxu1 %v6360_v42 }
 0x51b   : > { %5446 = vmatmul.mubr.msk.f32.vlgmr.msra.gmra.mxu0 %vm514_vm0, %v5443_v25  ;;  %5652 = vmatprep.mubr.msk.f32.mxu1 %vm5800_vm13, %v6360_v42 }
 0x51c   : > { %3779 = vmatprep.mubr.f32.mxu0 %v6360_v42 }
 0x5ae   : > { %v2265_v31 = vpop.f32.mrf.mxu1 }
 0x5b0   : > { %v5609_v32 = vpop.f32.mrf.mxu1 }
 0x5b2   : > { %v2415_v34 = vpop.f32.mrf.mxu1 }
 0x5b3   : > { %v2416_v48 = vadd.f32 %v2415_v34, %v2265_v31 }
 0x5b4   : > { %v5614_v7 = vpop.f32.mrf.mxu1 }
 0x5b6   : > { %v2580_v37 = vpop.f32.mrf.mxu1 }
 0x5b7   : > { %v2586_v53 = vadd.f32 %v2580_v37, %v2416_v48 }
 0x5b8   : > { %v5619_v38 = vpop.f32.mrf.mxu1 }
 0x5ba   : > { %v2748_v39 = vpop.f32.mrf.mxu1 }
 0x5bb   : > { %v2194_v40 = vpop.f32.mrf.mxu0  ;;  %v2754_v59 = vadd.f32 %v2748_v39, %v2586_v53 }
 0x5bc   : > { %v5624_v41 = vpop.f32.mrf.mxu1 }
 0x5bd   : > { %v2196_v43 = vpop.f32.mrf.mxu0 }
 0x5bf   : > { %v2916_v44 = vpop.f32.mrf.mxu1  ;;  %v2344_v45 = vpop.f32.mrf.mxu0 }
 0x5c0   : > { %v2345_v63 = vadd.f32 %v2344_v45, %v2194_v40  ;;  %v2922_v1 = vadd.f32 %v2916_v44, %v2754_v59 }
 0x5c1   : > { %v5629_v46 = vpop.f32.mrf.mxu1  ;;  %v2346_v47 = vpop.f32.mrf.mxu0 }
 0x5c2   : > { %v2347_v29 = vadd.f32 %v2346_v47, %v2196_v43 }
 0x5c3   : > { %v3084_v49 = vpop.f32.mrf.mxu1  ;;  %v2509_v50 = vpop.f32.mrf.mxu0 }
 0x5c4   : > { %v2584_v35 = vadd.f32 %v2509_v50, %v2345_v63  ;;  %v3090_v0 = vadd.f32 %v3084_v49, %v2922_v1 }
 0x5c5   : > { %v5634_v51 = vpop.f32.mrf.mxu1  ;;  %v2511_v52 = vpop.f32.mrf.mxu0 }
 0x5c6   : > { %v2585_v8 = vadd.f32 %v2511_v52, %v2347_v29 }
 0x5c7   : > { %v2677_v54 = vpop.f32.mrf.mxu0 }
 0x5c8   : > { %v2752_v10 = vadd.f32 %v2677_v54, %v2584_v35 }
 0x5c9   : > { %v2679_v55 = vpop.f32.mrf.mxu0  ;;  %v3252_v58 = vpop.f32.mrf.mxu1 }
 0x5ca   : > { %v2753_v13 = vadd.f32 %v2679_v55, %v2585_v8  ;;  %v3258_v16 = vadd.f32 %v3252_v58, %v3090_v0 }
 0x5cb   : > { %v2845_v60 = vpop.f32.mrf.mxu0  ;;  %v5639_v61 = vpop.f32.mrf.mxu1 }
 0x5cc   : > { %v2920_v15 = vadd.f32 %v2845_v60, %v2752_v10 }
 0x5cd   : > { %v2847_v62 = vpop.f32.mrf.mxu0 }
 0x5ce   : > { %v2921_v17 = vadd.f32 %v2847_v62, %v2753_v13 }
 0x5cf   : > { %v3013_v2 = vpop.f32.mrf.mxu0 }
 0x5d0   : > { %v3088_v18 = vadd.f32 %v3013_v2, %v2920_v15 }
 0x5d1   : > { %v3015_v3 = vpop.f32.mrf.mxu0 }
 0x5d2   : > { %v3420_v6 = vpop.f32.mrf.mxu1  ;;  %v3089_v20 = vadd.f32 %v3015_v3, %v2921_v17 }
 0x5d3   : > { %v3181_v11 = vpop.f32.mrf.mxu0  ;;  %v3426_v22 = vadd.f32 %v3420_v6, %v3258_v16 }
 0x5d4   : > { %v5644_v12 = vpop.f32.mrf.mxu1  ;;  %v3256_v23 = vadd.f32 %v3181_v11, %v3088_v18 }
 0x5d5   : > { %v3183_v30 = vpop.f32.mrf.mxu0 }
 0x5d6   : > { %v3257_v36 = vadd.f32 %v3183_v30, %v3089_v20 }
 0x5d7   : > { %v3349_v19 = vpop.f32.mrf.mxu0 }
 0x5d8   : > { %v3424_v26 = vadd.f32 %v3349_v19, %v3256_v23 }
 0x5d9   : > { %v3351_v24 = vpop.f32.mrf.mxu0  ;;  %v3588_v25 = vpop.f32.mrf.mxu1 }
 0x5da   : > { %v3594_v27 = vadd.f32 %v3588_v25, %v3426_v22  ;;  %v3425_v32 = vadd.f32 %v3351_v24, %v3257_v36 }
 0x5db   : > { %v3517_v28 = vpop.f32.mrf.mxu0  ;;  %v5649_v31 = vpop.f32.mrf.mxu1 }
 0x5dc   : > { %v3592_v34 = vadd.f32 %v3517_v28, %v3424_v26  ;;  %v3597_v37 = vsel %vm6249_vm7, %v3594_v27, 0.0 }
 0x5dd   : > { %v3519_v7 = vpop.f32.mrf.mxu0  ;;  %v3615_v46 = vmul.f32 %v3597_v37, %v3597_v37  ;;  %v3601_v48 = vsel %vm6748_vm3, %v3597_v37, 0.0 }
 0x5de   : > { %v3595_v38 = vsel %vm6253_vm6, %v3592_v34, 0.0  ;;  %v3593_v39 = vadd.f32 %v3519_v7, %v3425_v32 }
 0x5df   : > { %v3613_v40 = vmul.f32 %v3595_v38, %v3595_v38  ;;  %v3598_v44 = vsel %vm518_vm15, %v3595_v38, 0.0  ;;  %v3619_v53 = vsel %vm6749_vm9, %v3615_v46, 0.0  ;;  %vm6756_vm9 = vcmask 744448  }
 0x5e0   : > { %v3596_v41 = vsel %vm6257_vm5, %v3593_v39, 0.0 }
 0x5e1   : > { %v3614_v43 = vmul.f32 %v3596_v41, %v3596_v41  ;;  %v3599_v45 = vsel %vm518_vm15, %v3596_v41, 0.0  ;;  %v3616_v49 = vsel %vm518_vm15, %v3613_v40, 0.0 }
 0x5e2   : > { %v3600_v47 = vadd.f32 %v3599_v45, %v3598_v44 }
 0x5e3   : > { %v3617_v50 = vsel %vm518_vm15, %v3614_v43, 0.0 }
 0x5e4   : > { %v3602_v51 = vadd.f32 %v3601_v48, %v3600_v47  ;;  %v3618_v52 = vadd.f32 %v3617_v50, %v3616_v49 }
 0x5e6   : > { %3603 = vadd.xlane.f32.xlu1 %v3602_v51  ;;  %v3620_v54 = vadd.f32 %v3619_v53, %v3618_v52 }
 0x5e8   : > { %3621 = vadd.xlane.f32.xlu0 %v3620_v54 }
 0x66f   : > { %v3604_v55 = vpop.xlane.xlu1 %3603 }
 0x670   : > { %v3605_v58 = vrot.slane %v3604_v55, 4 }
 0x671   : > { %v3622_v59 = vpop.xlane.xlu0 %3621 }
 0x672   : > { %v3606_v60 = vadd.f32 %v3605_v58, %v3604_v55  ;;  %v3623_v61 = vrot.slane %v3622_v59, 4  ;;  %v5450_v55 = vld [vmem:[%s6717_s1 + $0x4c] sm:$0xf] }
 0x674   : > { %v3607_v62 = vrot.slane %v3606_v60, 2  ;;  %v3624_v63 = vadd.f32 %v3623_v61, %v3622_v59 }
 0x676   : > { %v3625_v1 = vrot.slane %v3624_v63, 2  ;;  %v3608_v2 = vadd.f32 %v3607_v62, %v3606_v60  ;;  %v5449_v60 = vld [vmem:[%s6717_s1 + $0x48] sm:$0xf] }
 0x678   : > { %v3609_v29 = vrot.slane %v3608_v2, 1  ;;  %v3626_v35 = vadd.f32 %v3625_v1, %v3624_v63  ;;  %v5461_v63 = vld [vmem:[%s6717_s1 + $0x50] sm:$0xf] }
 0x67a   : > { %v3610_v3 = vadd.f32 %v3609_v29, %v3608_v2  ;;  %v3627_v6 = vrot.slane %v3626_v35, 1  ;;  %v5467_v29 = vld [vmem:[%s6717_s1 + $0x54] sm:$0xf] }
 0x67c   : > { %5706 = vpush %v3610_v3  ;;  %v3628_v8 = vadd.f32 %v3627_v6, %v3626_v35 }
 0x67e   : > { %5708 = vpush %v3628_v8 }
 0x6ad   : > { %s5707_s28 = spop %5706 }
 0x6ae   : > { %v3612_v0 = vstv %s5707_s28 }
 0x6af   : > { %v3631_v10 = vmul.f32 0.0009765625, %v3612_v0  ;;  %s5709_s29 = spop %5708 }
 0x6b0   : > { %v3630_v11 = vstv %s5709_s29  ;;  %s5695_s29 = smul.u32 12, %s6766_s13 }
 0x6b1   : > { %v3633_v12 = vmul.f32 %v3631_v10, %v3631_v10  ;;  %v3632_v13 = vmul.f32 0.0009765625, %v3630_v11  ;;  %v5473_v11 = vld [vmem:[%s6717_s1 + $0x58] sm:$0xf] }
 0x6b3   : > { %v3634_v15 = vsub.f32 %v3632_v13, %v3633_v12 }
 0x6b5   : > { %v3635_v30 = vadd.f32 1e-05, %v3634_v15 }
 0x6b7   : > { %5769 = vrsqrt.f32 %v3635_v30 }
 0x6c4   : > { %v5770_v16 = vpop.eup %5769 }
 0x6c5   : > { %v3637_v17 = vmul.f32 %v5770_v16, %v6288_v57  ;;  %v5479_v16 = vld [vmem:[%s6717_s1 + $0x5c] sm:$0xf] }
 0x6c7   : > { %3646 = vperm.xlu1 %5752, %v3637_v17   ;;  %v3638_v18 = vmul.f32 %v3637_v17, %v3631_v10 }
 0x6c9   : > { %3640 = vrot.lane.b32.xlu0 %v3638_v18, %s5808_s21 }
 0x6cb   : > { %5753 = vset.pattern.permute.xlu1 %v5807_v56 }
 0x73b   : > { %v3641_v19 = vpop.permute.xlu0 %3640 }
 0x73c   : > { %v3643_v20 = vsub.f32 %v6288_v57, %v3641_v19 }
 0x73e   : > { %3654 = vperm.xlu1 %5753, %v3643_v20  }
 0x742   : > { %5754 = vset.pattern.permute.xlu1 %v5806_v33  ;;  %v3647_v22 = vpop.permute.xlu1 %3646 }
 0x743   : > { %v3649_v23 = vmul.f32 %v3647_v22, %v3595_v38  ;;  %v3650_v24 = vmul.f32 %v3647_v22, %v3596_v41  ;;  %v3651_v25 = vmul.f32 %v3647_v22, %v3597_v37 }
 0x7b9   : > { %v3655_v36 = vpop.permute.xlu1 %3654 }
 0x7ba   : > { %v3657_v26 = vadd.f32 %v3655_v36, %v3649_v23  ;;  %v3658_v27 = vadd.f32 %v3655_v36, %v3650_v24  ;;  %v3659_v28 = vadd.f32 %v3655_v36, %v3651_v25  ;;  %v5485_v23 = vld [vmem:[%s6717_s1 + $0x60] sm:$0xf] }
 0x7bc   : > { %vm3660_vm11 = vcmp.ge.f32.partialorder %v3657_v26, 0.0  ;;  %vm3661_vm8 = vcmp.ge.f32.partialorder %v3658_v27, 0.0  ;;  %v3663_v31 = vmul.f32 %v3657_v26, %v6297_v5  ;;  %v3664_v56 = vmul.f32 %v3658_v27, %v6297_v5 }
 0x7bd   : > { %vm3662_vm3 = vcmp.ge.f32.partialorder %v3659_v28, 0.0  ;;  %v3665_v57 = vmul.f32 %v3659_v28, %v6297_v5 }
 0x7be   : > { %v3666_v32 = vsel %vm3660_vm11, %v3657_v26, %v3663_v31  ;;  %v3667_v34 = vsel %vm3661_vm8, %v3658_v27, %v3664_v56  ;;  %vm6757_vm11 = vmmov %vm6756_vm9 }
 0x7bf   : > { %v3668_v33 = vsel %vm3662_vm3, %v3659_v28, %v3665_v57  ;;  %v3669_v7 = vsel %vm6253_vm6, %v3666_v32, 0.0  ;;  %v3670_v37 = vsel %vm6257_vm5, %v3667_v34, 0.0  ;;  %v5491_v57 = vld [vmem:[%s6717_s1 + $0x64] sm:$0xf] }
 0x7c0   : > { %v3671_v38 = vsel %vm6249_vm7, %v3668_v33, 0.0  ;;  %v3675_v39 = vcombine.low %v3669_v7, %v3670_v37 }
 0x7c1   : > { %3678 = vrot.lane.b32.xlu1 %v3671_v38, %s5785_s19 }
 0x7c2   : > { %3676 = vrot.lane.b32.xlu0 %v3675_v39, %s5785_s19  ;;  %s170_s19 = scalar_lea.vmem %s6719_s3, %s5695_s29 }
 0x833   : > { %v3679_v43 = vpop.permute.xlu1 %3678 }
 0x834   : > { %v3677_v40 = vpop.permute.xlu0 %3676 }
 0x835   : > { %v3680_v41 = vrot.slane %v3677_v40, 4 }
 0x837   : > { %v3681_v44 = vsel %vm2091_vm4, %v3680_v41, %v3677_v40  ;;  %v3682_v45 = vsel %vm2091_vm4, %v3680_v41, %v3679_v43  ;;  %v5497_v40 = vld [vmem:[%s6717_s1 + $0x68] sm:$0xf] }
 0x838   : > { %3685 = vst.msk [vmem:[#allocation4] sm:$0xff] %vm6310_vm12, %v3681_v44  ;;  %vm6754_vm12 = vcmask 752640  }
 0x839   : > { %3686 = vst.msk [vmem:[#allocation4 + $0x8] sm:$0xf] %vm2100_vm10, %v3682_v45  ;;  %vm6755_vm10 = vmmov %vm6754_vm12 }
 0x83f   : > { %v6515_v47 = vld [vmem:[#allocation4] sm:$0xff] }
 0x840   : > { %v3690_v46 = vld [vmem:[#allocation4 + $0x8] sm:$0xf]  ;;  %3698 = vrot.lane.b32.xlu0 %v6515_v47, %s5791_s25  ;;  %v4012_v21 = vcombine.high %v6515_v47, %v6515_v47 }
 0x841   : > { %3702 = vrot.lane.b32.xlu1 %v3690_v46, %s5791_s25  ;;  %v4007_v48 = vld [vmem:[#allocation4 + $0x8] sm:$0xf] }
 0x842   : > { %v4175_v49 = vld [vmem:[#allocation4 + $0x8] sm:$0xf] }
 0x843   : > { %v4343_v50 = vld [vmem:[#allocation4 + $0x8] sm:$0xf] }
 0x844   : > { %4017 = vrot.lane.b32.xlu0 %v4007_v48, %s5801_s7  ;;  %v4511_v51 = vld [vmem:[#allocation4 + $0x8] sm:$0xf] }
 0x845   : > { %4013 = vrot.lane.b32.xlu1 %v6515_v47, %s5801_s7  ;;  %v4679_v52 = vld [vmem:[#allocation4 + $0x8] sm:$0xf] }
 0x846   : > { %v4847_v53 = vld [vmem:[#allocation4 + $0x8] sm:$0xf] }
 0x847   : > { %v5015_v54 = vld [vmem:[#allocation4 + $0x8] sm:$0xf] }
 0x848   : > { %4181 = vrot.lane.b32.xlu0 %v6515_v47, %s5802_s8 }
 0x849   : > { %4185 = vrot.lane.b32.xlu1 %v4175_v49, %s5802_s8 }
 0x84c   : > { %3700 = vrot.lane.b32.xlu0 %v4012_v21, %s5791_s25 }
 0x84d   : > { %4349 = vrot.lane.b32.xlu1 %v6515_v47, %s5793_s27 }
 0x850   : > { %4353 = vrot.lane.b32.xlu0 %v4343_v50, %s5793_s27 }
 0x851   : > { %4015 = vrot.lane.b32.xlu1 %v4012_v21, %s5801_s7 }
 0x854   : > { %4517 = vrot.lane.b32.xlu0 %v6515_v47, %s5803_s9 }
 0x855   : > { %4521 = vrot.lane.b32.xlu1 %v4511_v51, %s5803_s9 }
 0x858   : > { %4183 = vrot.lane.b32.xlu0 %v4012_v21, %s5802_s8 }
 0x859   : > { %4351 = vrot.lane.b32.xlu1 %v4012_v21, %s5793_s27 }
 0x85c   : > { %4689 = vrot.lane.b32.xlu0 %v4679_v52, %s5804_s10 }
 0x85d   : > { %4685 = vrot.lane.b32.xlu1 %v6515_v47, %s5804_s10 }
 0x860   : > { %4519 = vrot.lane.b32.xlu0 %v4012_v21, %s5803_s9 }
 0x861   : > { %4687 = vrot.lane.b32.xlu1 %v4012_v21, %s5804_s10 }
 0x864   : > { %4853 = vrot.lane.b32.xlu0 %v6515_v47, %s5790_s24 }
 0x865   : > { %4857 = vrot.lane.b32.xlu1 %v4847_v53, %s5790_s24 }
 0x868   : > { %4855 = vrot.lane.b32.xlu0 %v4012_v21, %s5790_s24 }
 0x869   : > { %5023 = vrot.lane.b32.xlu1 %v4012_v21, %s5805_s11 }
 0x86c   : > { %5025 = vrot.lane.b32.xlu0 %v5015_v54, %s5805_s11 }
 0x86d   : > { %5021 = vrot.lane.b32.xlu1 %v6515_v47, %s5805_s11 }
 0x8b2   : > { %v3699_v59 = vpop.permute.xlu0 %3698 }
 0x8b3   : > { %v3703_v58 = vpop.permute.xlu1 %3702 }
 0x8b4   : > { %5651 = vmatpush3.msk.msra.mxu1 %vm518_vm15, %v3703_v58 }
 0x8b5   : > { %5653 = vmatmul.mubr.msk.f32.vlgmr.msra.gmra.mxu1 %vm514_vm0, %v5450_v55  ;;  %5655 = vmatprep.subr.mxu1 %v6360_v42 }
 0x8b6   : > { %5656 = vmatpush3.msk.msra.mxu1 %vm518_vm15, %v3690_v46  ;;  %5657 = vmatprep.mubr.msk.f32.mxu1 %vm5800_vm13, %v6360_v42  ;;  %v4018_v62 = vpop.permute.xlu0 %4017 }
 0x8b7   : > { %v4014_v61 = vpop.permute.xlu1 %4013  ;;  %5660 = vmatprep.subr.mxu1 %v6360_v42 }
 0x8b9   : > { %5658 = vmatmul.mubr.msk.f32.vlgmr.msra.gmra.mxu1 %vm514_vm0, %v5449_v60 }
 0x8ba   : > { %5661 = vmatpush3.msk.msra.mxu1 %vm518_vm15, %v4018_v62  ;;  %5662 = vmatprep.mubr.msk.f32.mxu1 %vm5800_vm13, %v6360_v42  ;;  %v4182_v2 = vpop.permute.xlu0 %4181 }
 0x8bb   : > { %v4186_v1 = vpop.permute.xlu1 %4185  ;;  %5665 = vmatprep.subr.mxu1 %v6360_v42 }
 0x8bd   : > { %5663 = vmatmul.mubr.msk.f32.vlgmr.msra.gmra.mxu1 %vm514_vm0, %v5461_v63 }
 0x8be   : > { %5666 = vmatpush3.msk.msra.mxu1 %vm518_vm15, %v4186_v1  ;;  %5667 = vmatprep.mubr.msk.f32.mxu1 %vm5800_vm13, %v6360_v42  ;;  %v3701_v3 = vpop.permute.xlu0 %3700 }
 0x8bf   : > { %v4350_v35 = vpop.permute.xlu1 %4349  ;;  %5670 = vmatprep.subr.mxu1 %v6360_v42  ;;  %v3704_v6 = vsel %vm296_vm14, %v3699_v59, %v3701_v3  ;;  %v3705_v8 = vsel %vm296_vm14, %v3701_v3, %v3703_v58  ;;  %vm6750_vm14 = vcmask 891904  }
 0x8c0   : > { %5451 = vmatprep.subr.msk.mxu0 %vm518_vm15, %v3705_v8 }
 0x8c1   : > { %5668 = vmatmul.mubr.msk.f32.vlgmr.msra.gmra.mxu1 %vm514_vm0, %v5467_v29  ;;  %5452 = vmatpush1.msk.msra.mxu0 %vm518_vm15, %v3704_v6 }
 0x8c2   : > { %5672 = vmatprep.mubr.msk.f32.mxu1 %vm5800_vm13, %v6360_v42  ;;  %5453 = vmatmul.mubr.msk.f32.vlgmr.msra.gmra.mxu0 %vm514_vm0, %v5450_v55  ;;  %v4354_v10 = vpop.permute.xlu0 %4353 }
 0x8c3   : > { %v4016_v0 = vpop.permute.xlu1 %4015  ;;  %5456 = vmatprep.subr.msk.mxu0 %vm518_vm15, %v4012_v21  ;;  %5671 = vmatpush3.msk.msra.mxu1 %vm518_vm15, %v4354_v10 }
 0x8c4   : > { %v4020_v12 = vsel %vm829_vm1, %v4016_v0, %v4018_v62  ;;  %5457 = vmatpush1.msk.msra.mxu0 %vm518_vm15, %v6515_v47  ;;  %3929 = vmatprep.mubr.f32.mxu0 %v6360_v42  ;;  %v4019_v13 = vsel %vm829_vm1, %v4014_v61, %v4016_v0  ;;  %vm6751_vm1 = vmmov %vm6750_vm14 }
 0x8c5   : > { %5462 = vmatprep.subr.msk.mxu0 %vm518_vm15, %v4020_v12  ;;  %5675 = vmatprep.subr.mxu1 %v6360_v42 }
 0x8c6   : > { %5673 = vmatmul.mubr.msk.f32.vlgmr.msra.gmra.mxu1 %vm514_vm0, %v5473_v11  ;;  %5458 = vmatmul.mubr.msk.f32.vlgmr.msra.gmra.mxu0 %vm514_vm0, %v5449_v60  ;;  %v4518_v30 = vpop.permute.xlu0 %4517 }
 0x8c7   : > { %v4522_v15 = vpop.permute.xlu1 %4521  ;;  %5677 = vmatprep.mubr.msk.f32.mxu1 %vm5800_vm13, %v6360_v42  ;;  %5463 = vmatpush1.msk.msra.mxu0 %vm518_vm15, %v4019_v13 }
 0x8c8   : > { %5676 = vmatpush3.msk.msra.mxu1 %vm518_vm15, %v4522_v15  ;;  %4094 = vmatprep.mubr.f32.mxu0 %v6360_v42 }
 0x8c9   : > { %5680 = vmatprep.subr.mxu1 %v6360_v42 }
 0x8ca   : > { %5678 = vmatmul.mubr.msk.f32.vlgmr.msra.gmra.mxu1 %vm514_vm0, %v5479_v16  ;;  %5464 = vmatmul.mubr.msk.f32.vlgmr.msra.gmra.mxu0 %vm514_vm0, %v5461_v63  ;;  %v4184_v18 = vpop.permute.xlu0 %4183 }
 0x8cb   : > { %v4352_v17 = vpop.permute.xlu1 %4351  ;;  %5682 = vmatprep.mubr.msk.f32.mxu1 %vm5800_vm13, %v6360_v42  ;;  %v4187_v19 = vsel %vm998_vm2, %v4182_v2, %v4184_v18  ;;  %v4188_v20 = vsel %vm998_vm2, %v4184_v18, %v4186_v1  ;;  %4262 = vmatprep.mubr.f32.mxu0 %v6360_v42  ;;  %vm6752_vm2 = vcmask 883712  }
 0x8cc   : > { %5468 = vmatprep.subr.msk.mxu0 %vm518_vm15, %v4188_v20  ;;  %v4356_v22 = vsel %vm6750_vm14, %v4352_v17, %v4354_v10  ;;  %v4355_v24 = vsel %vm6751_vm1, %v4350_v35, %v4352_v17  ;;  %vm6753_vm4 = vmmov %vm6752_vm2 }
 0x8cd   : > { %5469 = vmatpush1.msk.msra.mxu0 %vm518_vm15, %v4187_v19 }
 0x8ce   : > { %5470 = vmatmul.mubr.msk.f32.vlgmr.msra.gmra.mxu0 %vm514_vm0, %v5467_v29  ;;  %5474 = vmatprep.subr.msk.mxu0 %vm518_vm15, %v4356_v22  ;;  %v4690_v36 = vpop.permute.xlu0 %4689 }
 0x8cf   : > { %v4686_v25 = vpop.permute.xlu1 %4685  ;;  %5475 = vmatpush1.msk.msra.mxu0 %vm518_vm15, %v4355_v24  ;;  %5681 = vmatpush3.msk.msra.mxu1 %vm518_vm15, %v4690_v36 }
 0x8d0   : > { %4430 = vmatprep.mubr.f32.mxu0 %v6360_v42  ;;  %5683 = vmatmul.mubr.msk.f32.vlgmr.msra.gmra.mxu1 %vm514_vm0, %v5485_v23 }
 0x8d1   : > { %5685 = vmatprep.subr.mxu1 %v6360_v42  ;;  %5687 = vmatprep.mubr.msk.f32.mxu1 %vm5800_vm13, %v6360_v42 }
 0x8d2   : > { %5476 = vmatmul.mubr.msk.f32.vlgmr.msra.gmra.mxu0 %vm514_vm0, %v5473_v11  ;;  %v4520_v27 = vpop.permute.xlu0 %4519 }
 0x8d3   : > { %v4688_v26 = vpop.permute.xlu1 %4687  ;;  %v4523_v28 = vsel %vm6752_vm2, %v4518_v30, %v4520_v27  ;;  %v4524_v31 = vsel %vm6753_vm4, %v4520_v27, %v4522_v15  ;;  %4598 = vmatprep.mubr.f32.mxu0 %v6360_v42 }
 0x8d4   : > { %5480 = vmatprep.subr.msk.mxu0 %vm518_vm15, %v4524_v31  ;;  %v4692_v56 = vsel %vm6754_vm12, %v4688_v26, %v4690_v36  ;;  %v4691_v32 = vsel %vm6755_vm10, %v4686_v25, %v4688_v26 }
 0x8d5   : > { %5481 = vmatpush1.msk.msra.mxu0 %vm518_vm15, %v4523_v28 }
 0x8d6   : > { %5482 = vmatmul.mubr.msk.f32.vlgmr.msra.gmra.mxu0 %vm514_vm0, %v5479_v16  ;;  %5486 = vmatprep.subr.msk.mxu0 %vm518_vm15, %v4692_v56  ;;  %v4854_v33 = vpop.permute.xlu0 %4853 }
 0x8d7   : > { %v4858_v34 = vpop.permute.xlu1 %4857  ;;  %5487 = vmatpush1.msk.msra.mxu0 %vm518_vm15, %v4691_v32  ;;  %4766 = vmatprep.mubr.f32.mxu0 %v6360_v42 }
 0x8d8   : > { %5686 = vmatpush3.msk.msra.mxu1 %vm518_vm15, %v4858_v34 }
 0x8d9   : > { %5688 = vmatmul.mubr.msk.f32.vlgmr.msra.gmra.mxu1 %vm514_vm0, %v5491_v57  ;;  %5690 = vmatprep.subr.mxu1 %v6360_v42 }
 0x8da   : > { %5692 = vmatprep.mubr.msk.f32.mxu1 %vm5800_vm13, %v6360_v42  ;;  %5488 = vmatmul.mubr.msk.f32.vlgmr.msra.gmra.mxu0 %vm514_vm0, %v5485_v23  ;;  %v4856_v37 = vpop.permute.xlu0 %4855  ;;  %vm6758_vm13 = vcmask 736256  }
 0x8db   : > { %v5024_v7 = vpop.permute.xlu1 %5023  ;;  %v4859_v38 = vsel %vm6756_vm9, %v4854_v33, %v4856_v37  ;;  %v4860_v39 = vsel %vm6757_vm11, %v4856_v37, %v4858_v34  ;;  %4934 = vmatprep.mubr.f32.mxu0 %v6360_v42  ;;  %vm6759_vm8 = vmmov %vm6758_vm13 }
 0x8dc   : > { %5492 = vmatprep.subr.msk.mxu0 %vm518_vm15, %v4860_v39 }
 0x8dd   : > { %5493 = vmatpush1.msk.msra.mxu0 %vm518_vm15, %v4859_v38 }
 0x8de   : > { %5494 = vmatmul.mubr.msk.f32.vlgmr.msra.gmra.mxu0 %vm514_vm0, %v5491_v57  ;;  %v5026_v43 = vpop.permute.xlu0 %5025 }
 0x8df   : > { %v5022_v41 = vpop.permute.xlu1 %5021  ;;  %v5028_v45 = vsel %vm6759_vm8, %v5024_v7, %v5026_v43  ;;  %5691 = vmatpush3.msk.msra.mxu1 %vm518_vm15, %v5026_v43  ;;  %5102 = vmatprep.mubr.f32.mxu0 %v6360_v42 }
 0x8e0   : > { %v5027_v44 = vsel %vm6758_vm13, %v5022_v41, %v5024_v7  ;;  %5498 = vmatprep.subr.msk.mxu0 %vm518_vm15, %v5028_v45  ;;  %5693 = vmatmul.mubr.msk.f32.vlgmr.msra.gmra.mxu1 %vm514_vm0, %v5497_v40 }
 0x8e1   : > { %5499 = vmatpush1.msk.msra.mxu0 %vm518_vm15, %v5027_v44 }
 0x8e2   : > { %5500 = vmatmul.mubr.msk.f32.vlgmr.msra.gmra.mxu0 %vm514_vm0, %v5497_v40  ;;  %vm6760_vm0 = vcmask 257024  }
 0x8e3   : > { %vm6764_vm3 = vmmov %vm6760_vm0 }
 0x975   : > { %v3852_v46 = vpop.f32.mrf.mxu1 }
 0x977   : > { %v5654_v47 = vpop.f32.mrf.mxu1 }
 0x979   : > { %v4002_v48 = vpop.f32.mrf.mxu1 }
 0x97a   : > { %v4003_v60 = vadd.f32 %v4002_v48, %v3852_v46 }
 0x97b   : > { %v5659_v49 = vpop.f32.mrf.mxu1 }
 0x97d   : > { %v4167_v21 = vpop.f32.mrf.mxu1 }
 0x97e   : > { %v4173_v2 = vadd.f32 %v4167_v21, %v4003_v60 }
 0x97f   : > { %v5664_v50 = vpop.f32.mrf.mxu1 }
 0x981   : > { %v4335_v51 = vpop.f32.mrf.mxu1 }
 0x982   : > { %v3781_v52 = vpop.f32.mrf.mxu0  ;;  %v4341_v6 = vadd.f32 %v4335_v51, %v4173_v2 }
 0x983   : > { %v5669_v53 = vpop.f32.mrf.mxu1 }
 0x984   : > { %v3783_v54 = vpop.f32.mrf.mxu0 }
 0x986   : > { %v4503_v55 = vpop.f32.mrf.mxu1  ;;  %v3931_v42 = vpop.f32.mrf.mxu0 }
 0x987   : > { %v3932_v11 = vadd.f32 %v3931_v42, %v3781_v52  ;;  %v4509_v12 = vadd.f32 %v4503_v55, %v4341_v6 }
 0x988   : > { %v5674_v58 = vpop.f32.mrf.mxu1  ;;  %v3933_v59 = vpop.f32.mrf.mxu0 }
 0x989   : > { %v3934_v15 = vadd.f32 %v3933_v59, %v3783_v54 }
 0x98a   : > { %v4671_v61 = vpop.f32.mrf.mxu1  ;;  %v4096_v62 = vpop.f32.mrf.mxu0 }
 0x98b   : > { %v4171_v30 = vadd.f32 %v4096_v62, %v3932_v11  ;;  %v4677_v20 = vadd.f32 %v4671_v61, %v4509_v12 }
 0x98c   : > { %v5679_v63 = vpop.f32.mrf.mxu1  ;;  %v4098_v1 = vpop.f32.mrf.mxu0 }
 0x98d   : > { %v4172_v18 = vadd.f32 %v4098_v1, %v3934_v15 }
 0x98e   : > { %v4264_v29 = vpop.f32.mrf.mxu0 }
 0x98f   : > { %v4339_v19 = vadd.f32 %v4264_v29, %v4171_v30 }
 0x990   : > { %v4266_v35 = vpop.f32.mrf.mxu0  ;;  %v4839_v3 = vpop.f32.mrf.mxu1 }
 0x991   : > { %v4340_v24 = vadd.f32 %v4266_v35, %v4172_v18  ;;  %v4845_v26 = vadd.f32 %v4839_v3, %v4677_v20 }
 0x992   : > { %v4432_v8 = vpop.f32.mrf.mxu0  ;;  %v5684_v0 = vpop.f32.mrf.mxu1 }
 0x993   : > { %v4507_v25 = vadd.f32 %v4432_v8, %v4339_v19  ;;  %v5774_v19 = vld [vmem:[%s6718_s2] sm:$0xf] }
 0x994   : > { %v4434_v10 = vpop.f32.mrf.mxu0 }
 0x995   : > { %v4508_v27 = vadd.f32 %v4434_v10, %v4340_v24  ;;  %v3688_v24 = vld [vmem:[#allocation2 + $0x8] sm:$0xf] }
 0x996   : > { %v4600_v13 = vpop.f32.mrf.mxu0 }
 0x997   : > { %v4675_v28 = vadd.f32 %v4600_v13, %v4507_v25 }
 0x998   : > { %v4602_v16 = vpop.f32.mrf.mxu0 }
 0x999   : > { %v5007_v17 = vpop.f32.mrf.mxu1  ;;  %v4676_v56 = vadd.f32 %v4602_v16, %v4508_v27 }
 0x99a   : > { %v4768_v22 = vpop.f32.mrf.mxu0  ;;  %v5013_v57 = vadd.f32 %v5007_v17, %v4845_v26 }
 0x99b   : > { %v5689_v23 = vpop.f32.mrf.mxu1  ;;  %v4843_v32 = vadd.f32 %v4768_v22, %v4675_v28 }
 0x99c   : > { %v4770_v36 = vpop.f32.mrf.mxu0  ;;  %v3687_v23 = vld [vmem:[#allocation2] sm:$0xff] }
 0x99d   : > { %v4844_v7 = vadd.f32 %v4770_v36, %v4676_v56  ;;  %v5249_v26 = vcombine.high %v3687_v23, %v3687_v23 }
 0x99e   : > { %v4936_v31 = vpop.f32.mrf.mxu0 }
 0x99f   : > { %v5011_v37 = vadd.f32 %v4936_v31, %v4843_v32 }
 0x9a0   : > { %v4938_v34 = vpop.f32.mrf.mxu0  ;;  %v5175_v33 = vpop.f32.mrf.mxu1 }
 0x9a1   : > { %v5181_v38 = vadd.f32 %v5175_v33, %v5013_v57  ;;  %v5012_v41 = vadd.f32 %v4938_v34, %v4844_v7 }
 0x9a2   : > { %v5104_v39 = vpop.f32.mrf.mxu0  ;;  %v5694_v40 = vpop.f32.mrf.mxu1 }
 0x9a3   : > { %v5179_v43 = vadd.f32 %v5104_v39, %v5011_v37  ;;  %v5184_v45 = vsel %vm6249_vm7, %v5181_v38, 0.0  ;;  %vm6761_vm7 = vmmov %vm6760_vm0 }
 0x9a4   : > { %v5106_v44 = vpop.f32.mrf.mxu0  ;;  %v5202_v21 = vmul.f32 %v5184_v45, %v5184_v45  ;;  %v5188_v52 = vsel %vm6760_vm0, %v5184_v45, 0.0 }
 0x9a5   : > { %v6676_v46 = vsel %vm6253_vm6, %v5179_v43, 0.0  ;;  %v5180_v47 = vadd.f32 %v5106_v44, %v5012_v41  ;;  %vm6762_vm6 = vmmov %vm6751_vm1 }
 0x9a6   : > { %v5200_v48 = vmul.f32 %v6676_v46, %v6676_v46  ;;  %v5185_v50 = vsel %vm518_vm15, %v6676_v46, 0.0  ;;  %v5206_v42 = vsel %vm6761_vm7, %v5202_v21, 0.0 }
 0x9a7   : > { %v6682_v49 = vsel %vm6257_vm5, %v5180_v47, 0.0  ;;  %vm6763_vm5 = vmmov %vm6751_vm1 }
 0x9a8   : > { %v5186_v9 = vsel %vm518_vm15, %v6682_v49, 0.0  ;;  %v5201_v4 = vmul.f32 %v6682_v49, %v6682_v49  ;;  %v5203_v53 = vsel %vm518_vm15, %v5200_v48, 0.0 }
 0x9a9   : > { %v5187_v51 = vadd.f32 %v5186_v9, %v5185_v50 }
 0x9aa   : > { %v5204_v54 = vsel %vm518_vm15, %v5201_v4, 0.0 }
 0x9ab   : > { %v5189_v14 = vadd.f32 %v5188_v52, %v5187_v51  ;;  %v5205_v55 = vadd.f32 %v5204_v54, %v5203_v53 }
 0x9ad   : > { %5190 = vadd.xlane.f32.xlu0 %v5189_v14  ;;  %v5207_v58 = vadd.f32 %v5206_v42, %v5205_v55 }
 0x9af   : > { %5208 = vadd.xlane.f32.xlu1 %v5207_v58 }
 0xa36   : > { %v5191_v59 = vpop.xlane.xlu0 %5190 }
 0xa37   : > { %v5192_v60 = vrot.slane %v5191_v59, 4 }
 0xa38   : > { %v5209_v61 = vpop.xlane.xlu1 %5208 }
 0xa39   : > { %v5193_v62 = vadd.f32 %v5192_v60, %v5191_v59  ;;  %v5210_v63 = vrot.slane %v5209_v61, 4 }
 0xa3b   : > { %v5194_v1 = vrot.slane %v5193_v62, 2  ;;  %v5211_v2 = vadd.f32 %v5210_v63, %v5209_v61 }
 0xa3d   : > { %v5212_v29 = vrot.slane %v5211_v2, 2  ;;  %v5195_v35 = vadd.f32 %v5194_v1, %v5193_v62 }
 0xa3f   : > { %v5196_v3 = vrot.slane %v5195_v35, 1  ;;  %v5213_v6 = vadd.f32 %v5212_v29, %v5211_v2 }
 0xa41   : > { %v5197_v8 = vadd.f32 %v5196_v3, %v5195_v35  ;;  %v5214_v0 = vrot.slane %v5213_v6, 1 }
 0xa43   : > { %5710 = vpush %v5197_v8  ;;  %v5215_v10 = vadd.f32 %v5214_v0, %v5213_v6 }
 0xa45   : > { %5712 = vpush %v5215_v10 }
 0xa74   : > { %s5711_s22 = spop %5710 }
 0xa75   : > { %v5199_v11 = vstv %s5711_s22 }
 0xa76   : > { %v5218_v12 = vmul.f32 0.0009765625, %v5199_v11  ;;  %s5713_s23 = spop %5712 }
 0xa77   : > { %v5217_v13 = vstv %s5713_s23 }
 0xa78   : > { %v5220_v15 = vmul.f32 %v5218_v12, %v5218_v12  ;;  %v5219_v30 = vmul.f32 0.0009765625, %v5217_v13 }
 0xa7a   : > { %v5221_v16 = vsub.f32 %v5219_v30, %v5220_v15 }
 0xa7c   : > { %v5222_v17 = vadd.f32 1e-05, %v5221_v16 }
 0xa7e   : > { %5771 = vrsqrt.f32 %v5222_v17 }
 0xa8b   : > { %v5772_v18 = vpop.eup %5771 }
 0xa8c   : > { %v5224_v20 = vmul.f32 %v5774_v19, %v5772_v18 }
 0xa8e   : > { %5233 = vperm.xlu1 %5754, %v5224_v20   ;;  %v5225_v22 = vmul.f32 %v5224_v20, %v5218_v12 }
 0xa90   : > { %5227 = vrot.lane.b32.xlu0 %v5225_v22, %s5808_s21 }
 0xa92   : > { %5250 = vrot.lane.b32.xlu1 %v3687_v23, %s5793_s27 }
 0xa96   : > { %5254 = vrot.lane.b32.xlu1 %v3688_v24, %s5793_s27 }
 0xb02   : > { %v5228_v25 = vpop.permute.xlu0 %5227 }
 0xb03   : > { %v5230_v36 = vsub.f32 %v5774_v19, %v5228_v25 }
 0xb05   : > { %5241 = vperm.xlu0 %5750, %v5230_v36  }
 0xb09   : > { %5252 = vrot.lane.b32.xlu0 %v5249_v26, %s5793_s27  ;;  %v5234_v27 = vpop.permute.xlu1 %5233 }
 0xb0a   : > { %v5238_v31 = vmul.f32 %v5234_v27, %v5184_v45  ;;  %v5236_v32 = vmul.f32 %v5234_v27, %v6676_v46  ;;  %v5237_v34 = vmul.f32 %v5234_v27, %v6682_v49 }
 0xb0d   : > { %v5251_v28 = vpop.permute.xlu1 %5250 }
 0xb11   : > { %v5255_v33 = vpop.permute.xlu1 %5254 }
 0xb80   : > { %v5242_v56 = vpop.permute.xlu0 %5241 }
 0xb81   : > { %v5246_v57 = vadd.f32 %v5242_v56, %v5238_v31  ;;  %v5244_v37 = vadd.f32 %v5242_v56, %v5236_v32  ;;  %v5245_v38 = vadd.f32 %v5242_v56, %v5237_v34 }
 0xb83   : > { %v5263_v7 = vadd.f32 %v5255_v33, %v5246_v57 }
 0xb84   : > { %v5253_v39 = vpop.permute.xlu0 %5252 }
 0xb85   : > { %vm5266_vm15 = vcmp.ge.f32.partialorder %v5263_v7, 0.0  ;;  %v5269_v40 = vmul.f32 %v5263_v7, %v6297_v5  ;;  %v5256_v41 = vsel %vm6762_vm6, %v5251_v28, %v5253_v39  ;;  %v5257_v43 = vsel %vm6763_vm5, %v5253_v39, %v5255_v33 }
 0xb86   : > { %v5261_v44 = vadd.f32 %v5256_v41, %v5244_v37  ;;  %v5262_v45 = vadd.f32 %v5257_v43, %v5245_v38 }
 0xb87   : > { %v5272_v46 = vsel %vm5266_vm15, %v5263_v7, %v5269_v40 }
 0xb88   : > { %5278 = vst.msk [vmem:[%s170_s19 + $0x8] sm:$0xf] %vm6764_vm3, %v5272_v46  ;;  %vm5264_vm14 = vcmp.ge.f32.partialorder %v5261_v44, 0.0  ;;  %vm5265_vm1 = vcmp.ge.f32.partialorder %v5262_v45, 0.0  ;;  %v5267_v47 = vmul.f32 %v5261_v44, %v6297_v5  ;;  %v5268_v48 = vmul.f32 %v5262_v45, %v6297_v5 }
 0xb8a   : > { %v5270_v49 = vsel %vm5264_vm14, %v5261_v44, %v5267_v47  ;;  %v5271_v21 = vsel %vm5265_vm1, %v5262_v45, %v5268_v48 }
 0xb8b   : > { %v5275_v50 = vcombine.low %v5270_v49, %v5271_v21 }
 0xb8d   : > { %5277 = vst [vmem:[%s170_s19] sm:$0xff] %v5275_v50 }
 0xb8e PF: > { %s13_s12 = sadd.s32 1, %s5781_s12  }
 0xb8f   : > { %p10_p4 = scmp.ge.s32.totalorder %s13_s12, 4  }
 0xb91   :  { %12 = sbr.rel (!%p10_p4) target bundleno = 1 (0x1), region = 88 }

</bundles_post_ra>
